<compile_context>
chip_gen: v7x
topology: tpu7x:2x2x1
jax: 0.10.0
libtpu: 0.0.40
codegen_flags: <defaults>
</compile_context>

<pallas_src>
import math

import jax
import jax.numpy as jnp
from jax.experimental import pallas as pl
from jax.experimental.pallas import tpu as pltpu


def _round_up(v, m):
    return ((v + m - 1) // m) * m


# --------------------------------- kernel ----------------------------------- #

def _elu(x):
    # ELU(alpha=1) on the f32 accumulator; exp runs on the EUP (free slot).
    return jnp.where(x > 0, x, jnp.exp(jnp.minimum(x, 0.0)) - 1.0)


def make_nav_kernel(plan):
    """Fully-fused forward: a short chain of wide block-diagonal matmuls."""
    n_branch, n_merge, n_hist, n_out = plan["depths"]
    bias_bands = plan["bias_bands"]      # ((offset, width), ...) per stage
    nlo = plan["nlo"]                    # non-lidar embedding width
    cdt = plan["compute_dtype"]

    def kernel(x_ref, *refs):
        o_ref = refs[-1]
        bias_ref = refs[-2]
        w = refs[:-2]

        def bias(i):
            off, width = bias_bands[i]
            return bias_ref[:, off:off + width]          # (1, width) f32

        def dot(a, b):
            return jnp.dot(a, b, preferred_element_type=jnp.float32)

        h = x_ref[...]                                   # (block_b, in_dim) bf16
        wi = 0
        bi = 0

        # Branch stages: blockdiag(non_lidar, H x (lidar, lidar_extra)) per depth.
        for _ in range(n_branch):
            h = _elu(dot(h, w[wi][...]) + bias(bi)).astype(cdt)
            wi += 1
            bi += 1

        nl = h[:, 0:nlo]                                 # non-lidar embedding

        # Merge stages (blockdiag over the H history steps) then history MLP.
        # After the last merge stage the activation IS history_merged.view(B, H*M).
        for _ in range(n_merge + n_hist):
            h = _elu(dot(h, w[wi][...]) + bias(bi)).astype(cdt)
            wi += 1
            bi += 1

        # Out MLP, first layer: torch.cat((non_lidar_out, history_out)) folded
        # into two row-blocks of the same weight.
        o = dot(nl, w[wi][...]) + dot(h, w[wi + 1][...]) + bias(bi)
        wi += 2
        bi += 1
        for _ in range(1, n_out):
            o = _elu(o).astype(cdt)
            o = dot(o, w[wi][...]) + bias(bi)
            wi += 1
            bi += 1
        # Final layer has no ELU; columns >= out_dim are zero (lane-dense pad).
        o_ref[...] = o.astype(o_ref.dtype)

    return kernel


# --------------------------- parameter packing ------------------------------ #

def pack_nav_params(params, cfg, compute_dtype=jnp.bfloat16):
    """Pack per-layer Linear params into block-diagonal per-depth matrices."""
    if cfg.get("gru_dim") is not None:
        # TODO(synk): GRUHistoryProcessor (gru_dim != None) needs a sequential
        # GRU over the history axis; only the MLP history path is implemented.
        raise NotImplementedError("gru_dim path not implemented")

    NL, L, E, H = (cfg["non_lidar_dim"], cfg["lidar_dim"],
                   cfg["lidar_extra_dim"], cfg["history_length"])
    nl_dims = list(cfg["non_lidar_layer_dims"])
    lid_dims = list(cfg["lidar_compress_layer_dims"])
    ext_dims = list(cfg["lidar_extra_in_dims"])
    mrg_dims = list(cfg["lidar_extra_merge_mlp_dims"])
    hst_dims = list(cfg["history_processing_mlp_dims"])
    out_dims = list(cfg["out_layer_dims"]) + [cfg["out_dim"]]
    # TODO(synk): block-diag packing assumes the three branch MLPs share a depth
    # (true for this module's configs); unequal depths would need ELU-masked
    # identity passthrough blocks.
    assert len(nl_dims) == len(lid_dims) == len(ext_dims)

    def blockdiag(rows, cols, blocks):
        m = jnp.zeros((rows, cols), jnp.float32)
        for r0, c0, wt in blocks:
            m = m.at[r0:r0 + wt.shape[0], c0:c0 + wt.shape[1]].set(wt)
        return m

    weights, biases = [], []

    # ---- branch stages: non_lidar + H x (lidar, lidar_extra) per depth ----- #
    h_offs = [(NL + h * (L + E), NL + h * (L + E) + L) for h in range(H)]
    in_total = NL + H * (L + E)
    for k in range(len(nl_dims)):
        onl, olid, oext = nl_dims[k], lid_dims[k], ext_dims[k]
        out_total = onl + H * (olid + oext)
        blocks = [(0, 0, params["non_lidar_w"][k])]
        bparts = [params["non_lidar_b"][k]]
        for h in range(H):
            lr, er = h_offs[h]
            lc = onl + h * (olid + oext)
            blocks.append((lr, lc, params["lidar_w"][k]))
            blocks.append((er, lc + olid, params["extra_w"][k]))
            bparts += [params["lidar_b"][k], params["extra_b"][k]]
        weights.append(blockdiag(in_total, out_total, blocks))
        biases.append(jnp.concatenate(bparts, axis=1))
        h_offs = [(onl + h * (olid + oext), onl + h * (olid + oext) + olid)
                  for h in range(H)]
        in_total = out_total

    NLO, C, EIN = nl_dims[-1], lid_dims[-1], ext_dims[-1]

    # ---- merge stages: blockdiag over the H history steps ------------------ #
    h_off = [NLO + h * (C + EIN) for h in range(H)]      # cat(lo, eo) per step
    for k in range(len(mrg_dims)):
        ow = mrg_dims[k]
        blocks = [(h_off[h], h * ow, params["merge_w"][k]) for h in range(H)]
        weights.append(blockdiag(in_total, H * ow, blocks))
        biases.append(jnp.concatenate([params["merge_b"][k]] * H, axis=1))
        h_off = [h * ow for h in range(H)]
        in_total = H * ow

    # ---- history MLP (view(B, H*M) is already the packed layout) ----------- #
    for k in range(len(hst_dims)):
        weights.append(params["hist_w"][k])
        biases.append(params["hist_b"][k])

    # ---- out MLP: fold cat(non_lidar_out, history_out); pad last to 128 ---- #
    out_pad = _round_up(max(cfg["out_dim"], 1), 128)

    def pad_cols(mat, cols):
        return jnp.zeros((mat.shape[0], cols), jnp.float32).at[:, :mat.shape[1]].set(mat)

    w0, b0 = params["out_w"][0], params["out_b"][0]
    w0_nl, w0_hs = w0[:NLO, :], w0[NLO:, :]
    if len(out_dims) == 1:                               # single (final) out layer
        w0_nl, w0_hs, b0 = pad_cols(w0_nl, out_pad), pad_cols(w0_hs, out_pad), pad_cols(b0, out_pad)
    weights += [w0_nl, w0_hs]
    biases.append(b0)
    for k in range(1, len(out_dims)):
        wk, bk = params["out_w"][k], params["out_b"][k]
        if k == len(out_dims) - 1:
            wk, bk = pad_cols(wk, out_pad), pad_cols(bk, out_pad)
        weights.append(wk)
        biases.append(bk)

    # ---- one packed f32 bias buffer with 128-aligned bands ----------------- #
    bias_bands, off = [], 0
    for b in biases:
        bias_bands.append((off, b.shape[1]))
        off += _round_up(b.shape[1], 128)
    bias_buf = jnp.zeros((1, off), jnp.float32)
    for (o0, wdt), b in zip(bias_bands, biases):
        bias_buf = bias_buf.at[:, o0:o0 + wdt].set(b.astype(jnp.float32))

    plan = dict(
        depths=(len(nl_dims), len(mrg_dims), len(hst_dims), len(out_dims)),
        bias_bands=tuple(bias_bands),
        nlo=NLO,
        in_dim=NL + H * (L + E),
        out_dim=cfg["out_dim"],
        out_pad=out_pad,
        compute_dtype=compute_dtype,
    )
    return dict(weights=[wt.astype(compute_dtype) for wt in weights],
                bias=bias_buf, plan=plan)


# --------------------------------- wrapper ---------------------------------- #

def nav_forward(x, packed, *, block_b=None):
    """NavigationLidar2dNetHistory forward as one fused Pallas TPU kernel."""
    plan = packed["plan"]
    weights, bias_buf = packed["weights"], packed["bias"]
    B, in_dim = x.shape
    assert in_dim == plan["in_dim"]
    out_pad, out_dim = plan["out_pad"], plan["out_dim"]

    x = x.astype(plan["compute_dtype"])

    if block_b is None:
        # >= 2 grid blocks whenever possible (v7x megacore + DMA/compute
        # overlap); cap the batch tile at 1024 rows (multiple of 8).
        block_b = 8 if B <= 8 else min(1024, _round_up(pl.cdiv(B, 2), 8))
    block_b = max(8, _round_up(block_b, 8))
    n_blocks = pl.cdiv(B, block_b)
    Bp = n_blocks * block_b
    if Bp != B:
        x = jnp.pad(x, ((0, Bp - B), (0, 0)))

    in_specs = [pl.BlockSpec((block_b, in_dim), lambda i: (i, 0))]
    # Packed weights / bias buffer: full-array blocks with constant index_map
    # -> fetched once, VMEM-resident across the whole batch grid.
    in_specs += [pl.BlockSpec(wt.shape, lambda i: (0, 0)) for wt in weights]
    in_specs += [pl.BlockSpec(bias_buf.shape, lambda i: (0, 0))]
    out_spec = pl.BlockSpec((block_b, out_pad), lambda i: (i, 0))

    out = pl.pallas_call(
        make_nav_kernel(plan),
        grid=(n_blocks,),
        in_specs=in_specs,
        out_specs=out_spec,
        out_shape=jax.ShapeDtypeStruct((Bp, out_pad), jnp.float32),
        compiler_params=pltpu.CompilerParams(
            dimension_semantics=("parallel",)),
    )(x, *weights, bias_buf)
    return out[:B, :out_dim]


# --------------------------- parameter construction ------------------------- #

def init_linear(key, in_dim, out_dim):
    kw, kb = jax.random.split(key)
    bound = 1.0 / math.sqrt(in_dim)
    w = jax.random.uniform(kw, (in_dim, out_dim), jnp.float32, -bound, bound)
    b = jax.random.uniform(kb, (1, out_dim), jnp.float32, -bound, bound)
    return w, b


def init_chain(key, in_dim, dims):
    ws, bs = [], []
    cur = in_dim
    for d in dims:
        key, sub = jax.random.split(key)
        w, b = init_linear(sub, cur, d)
        ws.append(w)
        bs.append(b)
        cur = d
    return ws, bs


def init_nav_params(key, cfg):
    k = jax.random.split(key, 6)
    nl_w, nl_b = init_chain(k[0], cfg["non_lidar_dim"], cfg["non_lidar_layer_dims"])
    lid_w, lid_b = init_chain(k[1], cfg["lidar_dim"], cfg["lidar_compress_layer_dims"])
    ext_w, ext_b = init_chain(k[2], cfg["lidar_extra_dim"], cfg["lidar_extra_in_dims"])
    mrg_in = cfg["lidar_compress_layer_dims"][-1] + cfg["lidar_extra_in_dims"][-1]
    mrg_w, mrg_b = init_chain(k[3], mrg_in, cfg["lidar_extra_merge_mlp_dims"])
    hst_in = cfg["lidar_extra_merge_mlp_dims"][-1] * cfg["history_length"]
    hst_w, hst_b = init_chain(k[4], hst_in, cfg["history_processing_mlp_dims"])
    out_in = cfg["history_processing_mlp_dims"][-1] + cfg["non_lidar_layer_dims"][-1]
    out_w, out_b = init_chain(k[5], out_in,
                              list(cfg["out_layer_dims"]) + [cfg["out_dim"]])
    return dict(non_lidar_w=nl_w, non_lidar_b=nl_b, lidar_w=lid_w, lidar_b=lid_b,
                extra_w=ext_w, extra_b=ext_b, merge_w=mrg_w, merge_b=mrg_b,
                hist_w=hst_w, hist_b=hst_b, out_w=out_w, out_b=out_b)


# --------------------------- pure-JAX references ----------------------------- #

def _ref_chain(h, ws, bs, act_last=True, compute_dtype=None):
    n = len(ws)
    for l, (w, b) in enumerate(zip(ws, bs)):
        if compute_dtype is not None:
            y = jnp.dot(h.astype(compute_dtype), w.astype(compute_dtype),
                        preferred_element_type=jnp.float32) + b
        else:
            y = h @ w + b
        if l < n - 1 or act_last:
            y = jnp.where(y > 0, y, jnp.expm1(jnp.minimum(y, 0.0)))
        h = y
    return h


def ref_forward(x, params, cfg, compute_dtype=None):
    B = x.shape[0]
    NL, L, E, H = (cfg["non_lidar_dim"], cfg["lidar_dim"],
                   cfg["lidar_extra_dim"], cfg["history_length"])
    non_lidar = x[:, :NL]
    hist = x[:, NL:].reshape(B, H, L + E)

    def ch(h, name, **kw):
        return _ref_chain(h, params[name + "_w"], params[name + "_b"],
                          compute_dtype=compute_dtype, **kw)

    nl_out = ch(non_lidar, "non_lidar")
    lo = ch(hist[:, :, :L], "lidar")
    eo = ch(hist[:, :, L:], "extra")
    merged = ch(jnp.concatenate([lo, eo], axis=-1), "merge")
    hp = ch(merged.reshape(B, -1), "hist")
    out = ch(jnp.concatenate([nl_out, hp], axis=-1), "out", act_last=False)
    return out


# ----------------------------------- main ------------------------------------ #

if __name__ == "__main__":
    cfg = dict(
        non_lidar_dim=10,
        lidar_dim=32,
        lidar_extra_dim=4,
        history_length=4,
        non_lidar_layer_dims=[32, 16],
        lidar_compress_layer_dims=[64, 32],
        lidar_extra_in_dims=[16, 8],
        lidar_extra_merge_mlp_dims=[32, 16],
        history_processing_mlp_dims=[64, 32],
        out_layer_dims=[64, 32],
        out_dim=6,
        gru_dim=None,
    )
    batch = 64
    in_dim = cfg["non_lidar_dim"] + (cfg["lidar_dim"] + cfg["lidar_extra_dim"]) \
        * cfg["history_length"]

    key = jax.random.PRNGKey(0)
    key, kp, kx = jax.random.split(key, 3)
    params = init_nav_params(kp, cfg)
    x = jax.random.normal(kx, (batch, in_dim), jnp.float32)

    packed = pack_nav_params(params, cfg)          # bf16 MXU weights, f32 biases
    out = nav_forward(x, packed)                   # 2 grid blocks of 32 rows
    out = jax.block_until_ready(out)
    assert out.shape == (batch, cfg["out_dim"])

    # Tight check vs. a bf16-matched JAX reference (same casts as the kernel).
    ref_bf16 = ref_forward(x, params, cfg, compute_dtype=jnp.bfloat16)
    assert jnp.allclose(out, ref_bf16, atol=5e-3, rtol=5e-3), \
        "mismatch vs bf16-matched reference"
    # Loose sanity check vs. the pure-f32 reference (bf16 rounding only).
    ref_f32 = ref_forward(x, params, cfg)
    assert jnp.allclose(out, ref_f32, atol=1e-1, rtol=1e-1), \
        "mismatch vs f32 reference"

    print("KERNEL_OK")
</pallas_src>

<mosaic_0001>
module attributes {stable_mosaic.version = 11 : i64} {
  func.func @kernel(%arg0: i32, %arg1: memref<32x154xbf16, #tpu.memory_space<vmem>>, %arg2: memref<154x352xbf16, #tpu.memory_space<vmem>>, %arg3: memref<352x176xbf16, #tpu.memory_space<vmem>>, %arg4: memref<176x128xbf16, #tpu.memory_space<vmem>>, %arg5: memref<128x64xbf16, #tpu.memory_space<vmem>>, %arg6: memref<64x64xbf16, #tpu.memory_space<vmem>>, %arg7: memref<64x32xbf16, #tpu.memory_space<vmem>>, %arg8: memref<16x64xbf16, #tpu.memory_space<vmem>>, %arg9: memref<32x64xbf16, #tpu.memory_space<vmem>>, %arg10: memref<64x32xbf16, #tpu.memory_space<vmem>>, %arg11: memref<32x128xbf16, #tpu.memory_space<vmem>>, %arg12: memref<1x1536xf32, #tpu.memory_space<vmem>>, %arg13: memref<32x128xf32, #tpu.memory_space<vmem>>) attributes {dimension_semantics = [#tpu.dimension_semantics<parallel>], iteration_bounds = array<i64: 2>, scalar_prefetch = 0 : i64, scratch_operands = 0 : i64, tpu.core_type = #tpu.core_type<tc>, window_params = [{transform_indices = @transform_0, window_bounds = array<i64: 32, 154>}, {pipeline_mode = #tpu.pipeline_mode<synchronous>, transform_indices = @transform_1, window_bounds = array<i64: 154, 352>}, {pipeline_mode = #tpu.pipeline_mode<synchronous>, transform_indices = @transform_2, window_bounds = array<i64: 352, 176>}, {pipeline_mode = #tpu.pipeline_mode<synchronous>, transform_indices = @transform_3, window_bounds = array<i64: 176, 128>}, {pipeline_mode = #tpu.pipeline_mode<synchronous>, transform_indices = @transform_4, window_bounds = array<i64: 128, 64>}, {pipeline_mode = #tpu.pipeline_mode<synchronous>, transform_indices = @transform_5, window_bounds = array<i64: 64, 64>}, {pipeline_mode = #tpu.pipeline_mode<synchronous>, transform_indices = @transform_6, window_bounds = array<i64: 64, 32>}, {pipeline_mode = #tpu.pipeline_mode<synchronous>, transform_indices = @transform_7, window_bounds = array<i64: 16, 64>}, {pipeline_mode = #tpu.pipeline_mode<synchronous>, transform_indices = @transform_8, window_bounds = array<i64: 32, 64>}, {pipeline_mode = #tpu.pipeline_mode<synchronous>, transform_indices = @transform_9, window_bounds = array<i64: 64, 32>}, {pipeline_mode = #tpu.pipeline_mode<synchronous>, transform_indices = @transform_10, window_bounds = array<i64: 32, 128>}, {pipeline_mode = #tpu.pipeline_mode<synchronous>, transform_indices = @transform_11, window_bounds = array<i64: 1, 1536>}, {transform_indices = @transform_12, window_bounds = array<i64: 32, 128>}]} {
    %c0 = arith.constant 0 : index
    %c0_0 = arith.constant 0 : index
    %0 = vector.load %arg1[%c0, %c0_0] : memref<32x154xbf16, #tpu.memory_space<vmem>>, vector<32x154xbf16>
    %c0_1 = arith.constant 0 : index
    %c0_2 = arith.constant 0 : index
    %1 = vector.load %arg2[%c0_1, %c0_2] : memref<154x352xbf16, #tpu.memory_space<vmem>>, vector<154x352xbf16>
    %cst = arith.constant dense<0.000000e+00> : vector<32x352xf32>
    %2 = tpu.matmul %0, %1, %cst {dimension_numbers = #tpu.dot_dimension_numbers<[1], [0], [0], [1], [0, 0, 1, 1], [], []>} : vector<32x154xbf16>, vector<154x352xbf16>, vector<32x352xf32> -> vector<32x352xf32>
    %c0_3 = arith.constant 0 : index
    %c0_4 = arith.constant 0 : index
    %3 = vector.load %arg12[%c0_3, %c0_4] : memref<1x1536xf32, #tpu.memory_space<vmem>>, vector<1x352xf32>
    %4 = vector.broadcast %3 : vector<1x352xf32> to vector<32x352xf32>
    %5 = arith.addf %2, %4 : vector<32x352xf32>
    %cst_5 = arith.constant 0.000000e+00 : f32
    %6 = vector.broadcast %cst_5 : f32 to vector<32x352xf32>
    %7 = arith.cmpf ogt, %5, %6 : vector<32x352xf32>
    %cst_6 = arith.constant 0.000000e+00 : f32
    %8 = vector.broadcast %cst_6 : f32 to vector<32x352xf32>
    %9 = arith.minimumf %5, %8 : vector<32x352xf32>
    %10 = math.exp %9 : vector<32x352xf32>
    %cst_7 = arith.constant 1.000000e+00 : f32
    %11 = vector.broadcast %cst_7 : f32 to vector<32x352xf32>
    %12 = arith.subf %10, %11 : vector<32x352xf32>
    %13 = arith.select %7, %5, %12 : vector<32x352xi1>, vector<32x352xf32>
    %14 = arith.truncf %13 : vector<32x352xf32> to vector<32x352xbf16>
    %c0_8 = arith.constant 0 : index
    %c0_9 = arith.constant 0 : index
    %15 = vector.load %arg3[%c0_8, %c0_9] : memref<352x176xbf16, #tpu.memory_space<vmem>>, vector<352x176xbf16>
    %cst_10 = arith.constant dense<0.000000e+00> : vector<32x176xf32>
    %16 = tpu.matmul %14, %15, %cst_10 {dimension_numbers = #tpu.dot_dimension_numbers<[1], [0], [0], [1], [0, 0, 1, 1], [], []>} : vector<32x352xbf16>, vector<352x176xbf16>, vector<32x176xf32> -> vector<32x176xf32>
    %c0_11 = arith.constant 0 : index
    %c384 = arith.constant 384 : index
    %17 = vector.load %arg12[%c0_11, %c384] : memref<1x1536xf32, #tpu.memory_space<vmem>>, vector<1x176xf32>
    %18 = vector.broadcast %17 : vector<1x176xf32> to vector<32x176xf32>
    %19 = arith.addf %16, %18 : vector<32x176xf32>
    %cst_12 = arith.constant 0.000000e+00 : f32
    %20 = vector.broadcast %cst_12 : f32 to vector<32x176xf32>
    %21 = arith.cmpf ogt, %19, %20 : vector<32x176xf32>
    %cst_13 = arith.constant 0.000000e+00 : f32
    %22 = vector.broadcast %cst_13 : f32 to vector<32x176xf32>
    %23 = arith.minimumf %19, %22 : vector<32x176xf32>
    %24 = math.exp %23 : vector<32x176xf32>
    %cst_14 = arith.constant 1.000000e+00 : f32
    %25 = vector.broadcast %cst_14 : f32 to vector<32x176xf32>
    %26 = arith.subf %24, %25 : vector<32x176xf32>
    %27 = arith.select %21, %19, %26 : vector<32x176xi1>, vector<32x176xf32>
    %28 = arith.truncf %27 : vector<32x176xf32> to vector<32x176xbf16>
    %29 = vector.extract_strided_slice %28 {offsets = [0, 0], sizes = [32, 16], strides = [1, 1]} : vector<32x176xbf16> to vector<32x16xbf16>
    %c0_15 = arith.constant 0 : index
    %c0_16 = arith.constant 0 : index
    %30 = vector.load %arg4[%c0_15, %c0_16] : memref<176x128xbf16, #tpu.memory_space<vmem>>, vector<176x128xbf16>
    %cst_17 = arith.constant dense<0.000000e+00> : vector<32x128xf32>
    %31 = tpu.matmul %28, %30, %cst_17 {dimension_numbers = #tpu.dot_dimension_numbers<[1], [0], [0], [1], [0, 0, 1, 1], [], []>} : vector<32x176xbf16>, vector<176x128xbf16>, vector<32x128xf32> -> vector<32x128xf32>
    %c0_18 = arith.constant 0 : index
    %c640 = arith.constant 640 : index
    %32 = vector.load %arg12[%c0_18, %c640] : memref<1x1536xf32, #tpu.memory_space<vmem>>, vector<1x128xf32>
    %33 = vector.broadcast %32 : vector<1x128xf32> to vector<32x128xf32>
    %34 = arith.addf %31, %33 : vector<32x128xf32>
    %cst_19 = arith.constant 0.000000e+00 : f32
    %35 = vector.broadcast %cst_19 : f32 to vector<32x128xf32>
    %36 = arith.cmpf ogt, %34, %35 : vector<32x128xf32>
    %cst_20 = arith.constant 0.000000e+00 : f32
    %37 = vector.broadcast %cst_20 : f32 to vector<32x128xf32>
    %38 = arith.minimumf %34, %37 : vector<32x128xf32>
    %39 = math.exp %38 : vector<32x128xf32>
    %cst_21 = arith.constant 1.000000e+00 : f32
    %40 = vector.broadcast %cst_21 : f32 to vector<32x128xf32>
    %41 = arith.subf %39, %40 : vector<32x128xf32>
    %42 = arith.select %36, %34, %41 : vector<32x128xi1>, vector<32x128xf32>
    %43 = arith.truncf %42 : vector<32x128xf32> to vector<32x128xbf16>
    %c0_22 = arith.constant 0 : index
    %c0_23 = arith.constant 0 : index
    %44 = vector.load %arg5[%c0_22, %c0_23] : memref<128x64xbf16, #tpu.memory_space<vmem>>, vector<128x64xbf16>
    %cst_24 = arith.constant dense<0.000000e+00> : vector<32x64xf32>
    %45 = tpu.matmul %43, %44, %cst_24 {dimension_numbers = #tpu.dot_dimension_numbers<[1], [0], [0], [1], [0, 0, 1, 1], [], []>} : vector<32x128xbf16>, vector<128x64xbf16>, vector<32x64xf32> -> vector<32x64xf32>
    %c0_25 = arith.constant 0 : index
    %c768 = arith.constant 768 : index
    %46 = vector.load %arg12[%c0_25, %c768] : memref<1x1536xf32, #tpu.memory_space<vmem>>, vector<1x64xf32>
    %47 = vector.broadcast %46 : vector<1x64xf32> to vector<32x64xf32>
    %48 = arith.addf %45, %47 : vector<32x64xf32>
    %cst_26 = arith.constant 0.000000e+00 : f32
    %49 = vector.broadcast %cst_26 : f32 to vector<32x64xf32>
    %50 = arith.cmpf ogt, %48, %49 : vector<32x64xf32>
    %cst_27 = arith.constant 0.000000e+00 : f32
    %51 = vector.broadcast %cst_27 : f32 to vector<32x64xf32>
    %52 = arith.minimumf %48, %51 : vector<32x64xf32>
    %53 = math.exp %52 : vector<32x64xf32>
    %cst_28 = arith.constant 1.000000e+00 : f32
    %54 = vector.broadcast %cst_28 : f32 to vector<32x64xf32>
    %55 = arith.subf %53, %54 : vector<32x64xf32>
    %56 = arith.select %50, %48, %55 : vector<32x64xi1>, vector<32x64xf32>
    %57 = arith.truncf %56 : vector<32x64xf32> to vector<32x64xbf16>
    %c0_29 = arith.constant 0 : index
    %c0_30 = arith.constant 0 : index
    %58 = vector.load %arg6[%c0_29, %c0_30] : memref<64x64xbf16, #tpu.memory_space<vmem>>, vector<64x64xbf16>
    %cst_31 = arith.constant dense<0.000000e+00> : vector<32x64xf32>
    %59 = tpu.matmul %57, %58, %cst_31 {dimension_numbers = #tpu.dot_dimension_numbers<[1], [0], [0], [1], [0, 0, 1, 1], [], []>} : vector<32x64xbf16>, vector<64x64xbf16>, vector<32x64xf32> -> vector<32x64xf32>
    %c0_32 = arith.constant 0 : index
    %c896 = arith.constant 896 : index
    %60 = vector.load %arg12[%c0_32, %c896] : memref<1x1536xf32, #tpu.memory_space<vmem>>, vector<1x64xf32>
    %61 = vector.broadcast %60 : vector<1x64xf32> to vector<32x64xf32>
    %62 = arith.addf %59, %61 : vector<32x64xf32>
    %cst_33 = arith.constant 0.000000e+00 : f32
    %63 = vector.broadcast %cst_33 : f32 to vector<32x64xf32>
    %64 = arith.cmpf ogt, %62, %63 : vector<32x64xf32>
    %cst_34 = arith.constant 0.000000e+00 : f32
    %65 = vector.broadcast %cst_34 : f32 to vector<32x64xf32>
    %66 = arith.minimumf %62, %65 : vector<32x64xf32>
    %67 = math.exp %66 : vector<32x64xf32>
    %cst_35 = arith.constant 1.000000e+00 : f32
    %68 = vector.broadcast %cst_35 : f32 to vector<32x64xf32>
    %69 = arith.subf %67, %68 : vector<32x64xf32>
    %70 = arith.select %64, %62, %69 : vector<32x64xi1>, vector<32x64xf32>
    %71 = arith.truncf %70 : vector<32x64xf32> to vector<32x64xbf16>
    %c0_36 = arith.constant 0 : index
    %c0_37 = arith.constant 0 : index
    %72 = vector.load %arg7[%c0_36, %c0_37] : memref<64x32xbf16, #tpu.memory_space<vmem>>, vector<64x32xbf16>
    %cst_38 = arith.constant dense<0.000000e+00> : vector<32x32xf32>
    %73 = tpu.matmul %71, %72, %cst_38 {dimension_numbers = #tpu.dot_dimension_numbers<[1], [0], [0], [1], [0, 0, 1, 1], [], []>} : vector<32x64xbf16>, vector<64x32xbf16>, vector<32x32xf32> -> vector<32x32xf32>
    %c0_39 = arith.constant 0 : index
    %c1024 = arith.constant 1024 : index
    %74 = vector.load %arg12[%c0_39, %c1024] : memref<1x1536xf32, #tpu.memory_space<vmem>>, vector<1x32xf32>
    %75 = vector.broadcast %74 : vector<1x32xf32> to vector<32x32xf32>
    %76 = arith.addf %73, %75 : vector<32x32xf32>
    %cst_40 = arith.constant 0.000000e+00 : f32
    %77 = vector.broadcast %cst_40 : f32 to vector<32x32xf32>
    %78 = arith.cmpf ogt, %76, %77 : vector<32x32xf32>
    %cst_41 = arith.constant 0.000000e+00 : f32
    %79 = vector.broadcast %cst_41 : f32 to vector<32x32xf32>
    %80 = arith.minimumf %76, %79 : vector<32x32xf32>
    %81 = math.exp %80 : vector<32x32xf32>
    %cst_42 = arith.constant 1.000000e+00 : f32
    %82 = vector.broadcast %cst_42 : f32 to vector<32x32xf32>
    %83 = arith.subf %81, %82 : vector<32x32xf32>
    %84 = arith.select %78, %76, %83 : vector<32x32xi1>, vector<32x32xf32>
    %85 = arith.truncf %84 : vector<32x32xf32> to vector<32x32xbf16>
    %c0_43 = arith.constant 0 : index
    %c0_44 = arith.constant 0 : index
    %86 = vector.load %arg8[%c0_43, %c0_44] : memref<16x64xbf16, #tpu.memory_space<vmem>>, vector<16x64xbf16>
    %cst_45 = arith.constant dense<0.000000e+00> : vector<32x64xf32>
    %87 = tpu.matmul %29, %86, %cst_45 {dimension_numbers = #tpu.dot_dimension_numbers<[1], [0], [0], [1], [0, 0, 1, 1], [], []>} : vector<32x16xbf16>, vector<16x64xbf16>, vector<32x64xf32> -> vector<32x64xf32>
    %c0_46 = arith.constant 0 : index
    %c0_47 = arith.constant 0 : index
    %88 = vector.load %arg9[%c0_46, %c0_47] : memref<32x64xbf16, #tpu.memory_space<vmem>>, vector<32x64xbf16>
    %cst_48 = arith.constant dense<0.000000e+00> : vector<32x64xf32>
    %89 = tpu.matmul %85, %88, %cst_48 {dimension_numbers = #tpu.dot_dimension_numbers<[1], [0], [0], [1], [0, 0, 1, 1], [], []>} : vector<32x32xbf16>, vector<32x64xbf16>, vector<32x64xf32> -> vector<32x64xf32>
    %90 = arith.addf %87, %89 : vector<32x64xf32>
    %c0_49 = arith.constant 0 : index
    %c1152 = arith.constant 1152 : index
    %91 = vector.load %arg12[%c0_49, %c1152] : memref<1x1536xf32, #tpu.memory_space<vmem>>, vector<1x64xf32>
    %92 = vector.broadcast %91 : vector<1x64xf32> to vector<32x64xf32>
    %93 = arith.addf %90, %92 : vector<32x64xf32>
    %cst_50 = arith.constant 0.000000e+00 : f32
    %94 = vector.broadcast %cst_50 : f32 to vector<32x64xf32>
    %95 = arith.cmpf ogt, %93, %94 : vector<32x64xf32>
    %cst_51 = arith.constant 0.000000e+00 : f32
    %96 = vector.broadcast %cst_51 : f32 to vector<32x64xf32>
    %97 = arith.minimumf %93, %96 : vector<32x64xf32>
    %98 = math.exp %97 : vector<32x64xf32>
    %cst_52 = arith.constant 1.000000e+00 : f32
    %99 = vector.broadcast %cst_52 : f32 to vector<32x64xf32>
    %100 = arith.subf %98, %99 : vector<32x64xf32>
    %101 = arith.select %95, %93, %100 : vector<32x64xi1>, vector<32x64xf32>
    %102 = arith.truncf %101 : vector<32x64xf32> to vector<32x64xbf16>
    %c0_53 = arith.constant 0 : index
    %c0_54 = arith.constant 0 : index
    %103 = vector.load %arg10[%c0_53, %c0_54] : memref<64x32xbf16, #tpu.memory_space<vmem>>, vector<64x32xbf16>
    %cst_55 = arith.constant dense<0.000000e+00> : vector<32x32xf32>
    %104 = tpu.matmul %102, %103, %cst_55 {dimension_numbers = #tpu.dot_dimension_numbers<[1], [0], [0], [1], [0, 0, 1, 1], [], []>} : vector<32x64xbf16>, vector<64x32xbf16>, vector<32x32xf32> -> vector<32x32xf32>
    %c0_56 = arith.constant 0 : index
    %c1280 = arith.constant 1280 : index
    %105 = vector.load %arg12[%c0_56, %c1280] : memref<1x1536xf32, #tpu.memory_space<vmem>>, vector<1x32xf32>
    %106 = vector.broadcast %105 : vector<1x32xf32> to vector<32x32xf32>
    %107 = arith.addf %104, %106 : vector<32x32xf32>
    %cst_57 = arith.constant 0.000000e+00 : f32
    %108 = vector.broadcast %cst_57 : f32 to vector<32x32xf32>
    %109 = arith.cmpf ogt, %107, %108 : vector<32x32xf32>
    %cst_58 = arith.constant 0.000000e+00 : f32
    %110 = vector.broadcast %cst_58 : f32 to vector<32x32xf32>
    %111 = arith.minimumf %107, %110 : vector<32x32xf32>
    %112 = math.exp %111 : vector<32x32xf32>
    %cst_59 = arith.constant 1.000000e+00 : f32
    %113 = vector.broadcast %cst_59 : f32 to vector<32x32xf32>
    %114 = arith.subf %112, %113 : vector<32x32xf32>
    %115 = arith.select %109, %107, %114 : vector<32x32xi1>, vector<32x32xf32>
    %116 = arith.truncf %115 : vector<32x32xf32> to vector<32x32xbf16>
    %c0_60 = arith.constant 0 : index
    %c0_61 = arith.constant 0 : index
    %117 = vector.load %arg11[%c0_60, %c0_61] : memref<32x128xbf16, #tpu.memory_space<vmem>>, vector<32x128xbf16>
    %cst_62 = arith.constant dense<0.000000e+00> : vector<32x128xf32>
    %118 = tpu.matmul %116, %117, %cst_62 {dimension_numbers = #tpu.dot_dimension_numbers<[1], [0], [0], [1], [0, 0, 1, 1], [], []>} : vector<32x32xbf16>, vector<32x128xbf16>, vector<32x128xf32> -> vector<32x128xf32>
    %c0_63 = arith.constant 0 : index
    %c1408 = arith.constant 1408 : index
    %119 = vector.load %arg12[%c0_63, %c1408] : memref<1x1536xf32, #tpu.memory_space<vmem>>, vector<1x128xf32>
    %120 = vector.broadcast %119 : vector<1x128xf32> to vector<32x128xf32>
    %121 = arith.addf %118, %120 : vector<32x128xf32>
    %c0_64 = arith.constant 0 : index
    %c0_65 = arith.constant 0 : index
    %122 = vector.load %arg13[%c0_64, %c0_65] : memref<32x128xf32, #tpu.memory_space<vmem>>, vector<32x128xf32>
    tpu.vector_store %arg13[%c0_64, %c0_65], %121 {strides = array<i32>} : memref<32x128xf32, #tpu.memory_space<vmem>>, vector<32x128xf32>,
    return
  }
  func.func @transform_0(%arg0: i32) -> (i32, i32) {
    %c0_i32 = arith.constant 0 : i32
    %c0_i32_0 = arith.constant 0 : i32
    return %arg0, %c0_i32 : i32, i32
  }
  func.func @transform_1(%arg0: i32) -> (i32, i32) {
    %c0_i32 = arith.constant 0 : i32
    %c0_i32_0 = arith.constant 0 : i32
    %c0_i32_1 = arith.constant 0 : i32
    return %c0_i32, %c0_i32_0 : i32, i32
  }
  func.func @transform_2(%arg0: i32) -> (i32, i32) {
    %c0_i32 = arith.constant 0 : i32
    %c0_i32_0 = arith.constant 0 : i32
    %c0_i32_1 = arith.constant 0 : i32
    return %c0_i32, %c0_i32_0 : i32, i32
  }
  func.func @transform_3(%arg0: i32) -> (i32, i32) {
    %c0_i32 = arith.constant 0 : i32
    %c0_i32_0 = arith.constant 0 : i32
    %c0_i32_1 = arith.constant 0 : i32
    return %c0_i32, %c0_i32_0 : i32, i32
  }
  func.func @transform_4(%arg0: i32) -> (i32, i32) {
    %c0_i32 = arith.constant 0 : i32
    %c0_i32_0 = arith.constant 0 : i32
    %c0_i32_1 = arith.constant 0 : i32
    return %c0_i32, %c0_i32_0 : i32, i32
  }
  func.func @transform_5(%arg0: i32) -> (i32, i32) {
    %c0_i32 = arith.constant 0 : i32
    %c0_i32_0 = arith.constant 0 : i32
    %c0_i32_1 = arith.constant 0 : i32
    return %c0_i32, %c0_i32_0 : i32, i32
  }
  func.func @transform_6(%arg0: i32) -> (i32, i32) {
    %c0_i32 = arith.constant 0 : i32
    %c0_i32_0 = arith.constant 0 : i32
    %c0_i32_1 = arith.constant 0 : i32
    return %c0_i32, %c0_i32_0 : i32, i32
  }
  func.func @transform_7(%arg0: i32) -> (i32, i32) {
    %c0_i32 = arith.constant 0 : i32
    %c0_i32_0 = arith.constant 0 : i32
    %c0_i32_1 = arith.constant 0 : i32
    return %c0_i32, %c0_i32_0 : i32, i32
  }
  func.func @transform_8(%arg0: i32) -> (i32, i32) {
    %c0_i32 = arith.constant 0 : i32
    %c0_i32_0 = arith.constant 0 : i32
    %c0_i32_1 = arith.constant 0 : i32
    return %c0_i32, %c0_i32_0 : i32, i32
  }
  func.func @transform_9(%arg0: i32) -> (i32, i32) {
    %c0_i32 = arith.constant 0 : i32
    %c0_i32_0 = arith.constant 0 : i32
    %c0_i32_1 = arith.constant 0 : i32
    return %c0_i32, %c0_i32_0 : i32, i32
  }
  func.func @transform_10(%arg0: i32) -> (i32, i32) {
    %c0_i32 = arith.constant 0 : i32
    %c0_i32_0 = arith.constant 0 : i32
    %c0_i32_1 = arith.constant 0 : i32
    return %c0_i32, %c0_i32_0 : i32, i32
  }
  func.func @transform_11(%arg0: i32) -> (i32, i32) {
    %c0_i32 = arith.constant 0 : i32
    %c0_i32_0 = arith.constant 0 : i32
    %c0_i32_1 = arith.constant 0 : i32
    return %c0_i32, %c0_i32_0 : i32, i32
  }
  func.func @transform_12(%arg0: i32) -> (i32, i32) {
    %c0_i32 = arith.constant 0 : i32
    %c0_i32_0 = arith.constant 0 : i32
    return %arg0, %c0_i32 : i32, i32
  }
}

</mosaic_0001>

<bundles_post_ra>
// kernel: tpu_custom_call.1
= control target key start
LH: loop header
LB: loop body
LE: loop exit
PB: predicated region body
PF: predicated region fallthrough
CT: control target
= control target key end

     0   :  { %17 = vsyncpa [#allocation3], 0  ;;  %s3644_s0 = inlined_call_operand.vmem [shape: bf16[64,154], index: 0, kind: input, shape index: {}]   ;;  %s3645_s1 = inlined_call_operand.vmem [shape: bf16[154,352], index: 1, kind: input, shape index: {}]   ;;  %s3646_s2 = inlined_call_operand.vmem [shape: bf16[352,176], index: 2, kind: input, shape index: {}]   ;;  %s3647_s3 = inlined_call_operand.vmem [shape: bf16[176,128], index: 3, kind: input, shape index: {}]   ;;  %s3648_s4 = inlined_call_operand.vmem [shape: bf16[128,64], index: 4, kind: input, shape index: {}]   ;;  %s3649_s5 = inlined_call_operand.vmem [shape: bf16[64,64], index: 5, kind: input, shape index: {}]   ;;  %s3650_s6 = inlined_call_operand.vmem [shape: bf16[64,32], index: 6, kind: input, shape index: {}]   ;;  %s3651_s7 = inlined_call_operand.vmem [shape: bf16[16,64], index: 7, kind: input, shape index: {}]   ;;  %s3652_s8 = inlined_call_operand.vmem [shape: bf16[32,64], index: 8, kind: input, shape index: {}]   ;;  %s3653_s9 = inlined_call_operand.vmem [shape: bf16[64,32], index: 9, kind: input, shape index: {}]   ;;  %s3654_s10 = inlined_call_operand.vmem [shape: bf16[32,128], index: 10, kind: input, shape index: {}]   ;;  %s3655_s11 = inlined_call_operand.vmem [shape: f32[1,1536], index: 11, kind: input, shape index: {}]   ;;  %s3656_s12 = inlined_call_operand.hbm [shape: f32[64,128], index: 12, kind: output, shape index: {}]  }
   0x1   :  { %19 = vsyncpa [#allocation3 + $0x1], 0  ;;  %s3057_s21 = smov 0   ;;  %s3059_s22 = smov 0  }
   0x2   :  { %s3061_s23 = smov 0   ;;  %s3063_s24 = smov 0  }
   0x3 LB: > { %3658 = sst [smem:[#allocation5_spill]] %s2982_s23  ;;  %s3078_s25 = sadd.s32 4294967295, %s2986_s24   ;;  %s2986_s24 = sphi %s3063_s24, %s3666_s24   ;;  %s2982_s23 = sphi %s3061_s23, %s3663_s23   ;;  %s2978_s22 = sphi %s3059_s22, %s3665_s22   ;;  %s2974_s21 = sphi %s3057_s21, %s3664_s21  }
   0x4   : > { %s2308_s26 = sadd.s32 4294967294, %s2986_s24   ;;  %s3082_s27 = sadd.s32 1, %s2986_s24  }
   0x5   : > { %s289_s28 = sadd.s32 1, %s2982_s23  ;;  %s286_s29 = ssub.s32 %s2986_s24, %s3082_s27 }
   0x6   : > { %p299_p0 = scmp.ne.s32.totalorder %s2982_s23, %s2978_s22  ;;  %p287_p1 = scmp.eq.s32.totalorder %s286_s29, 0 }
   0x7   : > { %p300_p2 = scmp.eq.s32.totalorder %s3078_s25, 1  ;;  %p305_p3 = scmp.ne.s32.totalorder %s2978_s22, %s2974_s21 }
   0x8   : > { %p306_p4 = scmp.eq.s32.totalorder %s2308_s26, 1  ;;  %p2311_p7 = scmp.ge.s32.totalorder %s2986_s24, 1 }
   0x9   : > { %s3093_s30 = scalar_select %p287_p1, %s2982_s23, %s289_s28  }
   0xa   : > { %p3095_p5 = por %p300_p2, %p299_p0  ;;  %p3099_p6 = por %p306_p4, %p305_p3 }
   0xb   : > { %3659 = sst [smem:[#allocation6_spill]] %s3093_s30  ;;  %p367_p8 = scmp.lt.s32.totalorder %s2986_s24, 3 }
   0xd   : > { %p368_p9 = pnand %p2311_p7, %p367_p8 }
   0xe   : > { %v2688_v0 = vld [vmem:[%s3645_s1 + $0x4] ss:$12 sps:$4 sm:$0xff] (!%p368_p9)   ;;  %v2690_v1 = vld [vmem:[%s3645_s1] ss:$12 sps:$4 sm:$0xff] (!%p368_p9)   ;;  %v2988_v2 = vmov (!%p368_p9), 0   ;;  %s2313_s16 = sshll.u32 (!%p368_p9), %s3078_s25, 2 }
   0xf   : > { %371 = sbr.rel (%p368_p9) target bundleno = 2233 (0x8b9), region = 68  ;;  %725 = vmatprep.subr.bf16.mxu1 (!%p368_p9), %v2988_v2  ;;  %672 = vmatprep.subr.bf16.mxu0 (!%p368_p9), %v2688_v0  ;;  %v2691_v3 = vld [vmem:[%s3645_s1 + $0x1c] ss:$12 sps:$4 sm:$0xff] (!%p368_p9)   ;;  %v2693_v4 = vld [vmem:[%s3645_s1 + $0x18] ss:$12 sps:$4 sm:$0xff] (!%p368_p9)   ;;  %p411_p10 = scmp.lt.s32.totalorder (!%p368_p9), %s2313_s16, 7 }
  0x10   : > { %673 = vmatpush1.bf16.msra.mxu0 (!%p368_p9), %v2690_v1  ;;  %v2694_v5 = vld [vmem:[%s3645_s1 + $0x8] ss:$12 sps:$4 sm:$0xff] (!%p368_p9)   ;;  %v2698_v7 = vld [vmem:[%s3645_s1 + $0x20] ss:$12 sps:$4 sm:$0xff] (!%p368_p9)   ;;  %v2697_v8 = vld [vmem:[%s3645_s1 + $0x30] ss:$12 sps:$4 sm:$0xff] (!%p368_p9)  }
  0x11   : > { %674 = vmatprep.subr.bf16.mxu0 (!%p368_p9), %v2691_v3  ;;  %v2695_v6 = vld [vmem:[%s3645_s1 + $0x34] ss:$12 sps:$4 sm:$0xff] (!%p368_p9)   ;;  %726 = vmatpush1.bf16.msra.mxu1 (!%p368_p9), %v2694_v5  ;;  %v2699_v9 = vld [vmem:[%s3645_s1 + $0x4c] ss:$12 sps:$4 sm:$0xff] (!%p368_p9)   ;;  %v2703_v12 = vld [vmem:[%s3645_s1 + $0x64] ss:$12 sps:$4 sm:$0xff] (!%p368_p9)  }
  0x12   : > { %727 = vmatprep.subr.bf16.mxu1 (!%p368_p9), %v2988_v2  ;;  %v2702_v10 = vld [vmem:[%s3645_s1 + $0x38] ss:$12 sps:$4 sm:$0xff] (!%p368_p9)   ;;  %v2701_v11 = vld [vmem:[%s3645_s1 + $0x48] ss:$12 sps:$4 sm:$0xff] (!%p368_p9)   ;;  %v2706_v13 = vld [vmem:[%s3645_s1 + $0x50] ss:$12 sps:$4 sm:$0xff] (!%p368_p9)  }
  0x13   : > { %v2705_v14 = vld [vmem:[%s3645_s1 + $0x60] ss:$12 sps:$4 sm:$0xff] (!%p368_p9)   ;;  %v2707_v15 = vld [vmem:[%s3645_s1 + $0x7c] ss:$12 sps:$4 sm:$0xff] (!%p368_p9)   ;;  %v2709_v17 = vld [vmem:[%s3645_s1 + $0x78] ss:$12 sps:$4 sm:$0xff] (!%p368_p9)  }
  0x14   : > { %675 = vmatpush1.bf16.msra.mxu0 (!%p368_p9), %v2693_v4  ;;  %v2710_v16 = vld [vmem:[%s3645_s1 + $0x68] ss:$12 sps:$4 sm:$0xff] (!%p368_p9)   ;;  %v2714_v19 = vld [vmem:[%s3645_s1 + $0x80] ss:$12 sps:$4 sm:$0xff] (!%p368_p9)   ;;  %vm655_vm0 = vcmask (!%p368_p9), 211968   ;;  %vm662_vm1 = vcmask (!%p368_p9), 1044480  }
  0x15   : > { %676 = vmatprep.subr.bf16.mxu0 (!%p368_p9), %v2695_v6  ;;  %728 = vmatpush1.bf16.msra.mxu1 (!%p368_p9), %v2698_v7  ;;  %v2711_v18 = vld [vmem:[%s3645_s1 + $0x94] ss:$12 sps:$4 sm:$0xff] (!%p368_p9)   ;;  %v2713_v20 = vld [vmem:[%s3645_s1 + $0x90] ss:$12 sps:$4 sm:$0xff] (!%p368_p9)   ;;  %v2715_v22 = vld [vmem:[%s3645_s1 + $0xac] ss:$12 sps:$4 sm:$0xff] (!%p368_p9)  }
  0x16   : > { %729 = vmatprep.subr.bf16.mxu1 %v2988_v2  ;;  %s3668_s16 = smov (!%p411_p10, %s2313_s16), 7  ;;  %v2718_v23 = vld [vmem:[%s3645_s1 + $0x98] ss:$12 sps:$4 sm:$0xff]   ;;  %v2717_v24 = vld [vmem:[%s3645_s1 + $0xa8] ss:$12 sps:$4 sm:$0xff]   ;;  %vm1128_vm14 = vcmask 785408  }
  0x17   : > { %s2507_s23 = sshll.u32 %s3668_s16, 3  ;;  %v2719_v25 = vld [vmem:[%s3645_s1 + $0xc4] ss:$12 sps:$4 sm:$0xff]   ;;  %v2721_v27 = vld [vmem:[%s3645_s1 + $0xc0] ss:$12 sps:$4 sm:$0xff]   ;;  %s407_s19 = sand.u32 1, %s2978_s22  }
  0x18   : > { %677 = vmatpush1.bf16.msra.mxu0 %v2697_v8  ;;  %s3165_s28 = scalar_lea.vmem %s3644_s0, %s2507_s23  ;;  %v2722_v26 = vld [vmem:[%s3645_s1 + $0xb0] ss:$12 sps:$4 sm:$0xff]   ;;  %v2725_v29 = vld [vmem:[%s3645_s1 + $0xd8] ss:$12 sps:$4 sm:$0x1f]   ;;  %v2801_v8 = vld [vmem:[%s3647_s3 + $0x8] sm:$0xff]  }
  0x19   : > { %678 = vmatprep.subr.bf16.mxu0 %v2699_v9  ;;  %730 = vmatpush1.bf16.msra.mxu1 %v2702_v10  ;;  %v2728_v21 = vld [vmem:[%s3165_s28 + $0x4] ss:$8 sps:$4 sm:$0xff]   ;;  %v2723_v28 = vld [vmem:[%s3645_s1 + $0xdc] ss:$12 sps:$4 sm:$0x1f]   ;;  %v664_v32 = vsel %vm662_vm1, %v2725_v29, 0 }
  0x1a   : > { %731 = vmatprep.subr.bf16.mxu1 %v2988_v2  ;;  %2351 = vmatprep.mubr.msk.bf16.mxu0 %vm655_vm0, %v2728_v21  ;;  %v2729_v30 = vld [vmem:[%s3645_s1 + $0xc8] ss:$12 sps:$4 sm:$0xff]   ;;  %v2730_v31 = vld [vmem:[%s3645_s1 + $0xe0] ss:$12 sps:$4 sm:$0x1f]   ;;  %v2803_v10 = vld [vmem:[%s3647_s3 + $0x18] sm:$0xff]  }
  0x1b   : > { %2353 = vmatprep.mubr.msk.bf16.mxu1 %vm655_vm0, %v2728_v21  ;;  %v2736_v33 = vld [vmem:[%s3646_s2 + $0x4] ss:$8 sps:$4 sm:$0xff]   ;;  %v2726_v34 = vld [vmem:[%s3165_s28] ss:$8 sps:$4 sm:$0xff]   ;;  %v670_v35 = vsel %vm662_vm1, %v2730_v31, 0  ;;  %v2802_v9 = vld [vmem:[%s3647_s3 + $0x10] sm:$0xff]  }
  0x1c   : > { %679 = vmatpush1.bf16.msra.mxu0 %v2701_v11  ;;  %v2731_v36 = vld [vmem:[%s3165_s28 + $0x14] ss:$8 sps:$4 sm:$0xff]   ;;  %v2734_v37 = vld [vmem:[%s3646_s2] ss:$8 sps:$4 sm:$0xff]   ;;  %v2737_v39 = vld [vmem:[%s3646_s2 + $0x10] ss:$8 sps:$4 sm:$0xff]   ;;  %v465_v11 = vlaneseq }
  0x1d   : > { %680 = vmatprep.subr.bf16.mxu0 %v2703_v12  ;;  %732 = vmatpush1.bf16.msra.mxu1 %v2706_v13  ;;  %v2739_v38 = vld [vmem:[%s3646_s2 + $0x14] ss:$8 sps:$4 sm:$0xff]   ;;  %v2742_v40 = vld [vmem:[%s3646_s2 + $0x24] ss:$8 sps:$4 sm:$0xff]   ;;  %v2733_v41 = vld [vmem:[%s3165_s28 + $0x10] ss:$8 sps:$4 sm:$0xff]  }
  0x1e   : > { %733 = vmatprep.subr.bf16.mxu1 %v2988_v2  ;;  %v2740_v42 = vld [vmem:[%s3646_s2 + $0x20] ss:$8 sps:$4 sm:$0xff]   ;;  %v2745_v43 = vld [vmem:[%s3646_s2 + $0x34] ss:$8 sps:$4 sm:$0xff]   ;;  %v2743_v44 = vld [vmem:[%s3646_s2 + $0x30] ss:$8 sps:$4 sm:$0xff]  }
  0x1f   : > { %v2748_v45 = vld [vmem:[%s3646_s2 + $0x44] ss:$8 sps:$4 sm:$0xff]   ;;  %v2746_v46 = vld [vmem:[%s3646_s2 + $0x40] ss:$8 sps:$4 sm:$0xff]   ;;  %v2751_v47 = vld [vmem:[%s3646_s2 + $0x54] ss:$8 sps:$4 sm:$0xff]  }
  0x20   : > { %681 = vmatpush1.bf16.msra.mxu0 %v2705_v14  ;;  %v2749_v48 = vld [vmem:[%s3646_s2 + $0x50] ss:$8 sps:$4 sm:$0xff]   ;;  %v2754_v49 = vld [vmem:[%s3646_s2 + $0x64] ss:$8 sps:$4 sm:$0xff]   ;;  %v2752_v50 = vld [vmem:[%s3646_s2 + $0x60] ss:$8 sps:$4 sm:$0xff]  }
  0x21   : > { %682 = vmatprep.subr.bf16.mxu0 %v2707_v15  ;;  %734 = vmatpush1.bf16.msra.mxu1 %v2710_v16  ;;  %v2757_v51 = vld [vmem:[%s3646_s2 + $0x74] ss:$8 sps:$4 sm:$0xff]   ;;  %v2755_v52 = vld [vmem:[%s3646_s2 + $0x70] ss:$8 sps:$4 sm:$0xff]   ;;  %v2760_v53 = vld [vmem:[%s3646_s2 + $0x84] ss:$8 sps:$4 sm:$0xff]  }
  0x22   : > { %735 = vmatprep.subr.bf16.mxu1 %v2988_v2  ;;  %v2758_v54 = vld [vmem:[%s3646_s2 + $0x80] ss:$8 sps:$4 sm:$0xff]   ;;  %v2763_v55 = vld [vmem:[%s3646_s2 + $0x94] ss:$8 sps:$4 sm:$0xff]   ;;  %v2761_v56 = vld [vmem:[%s3646_s2 + $0x90] ss:$8 sps:$4 sm:$0xff]  }
  0x23   : > { %v2766_v57 = vld [vmem:[%s3646_s2 + $0xa4] ss:$8 sps:$4 sm:$0xff]   ;;  %v2764_v58 = vld [vmem:[%s3646_s2 + $0xa0] ss:$8 sps:$4 sm:$0xff]   ;;  %v2769_v59 = vld [vmem:[%s3646_s2 + $0xb4] ss:$8 sps:$4 sm:$0xff]  }
  0x24   : > { %683 = vmatpush1.bf16.msra.mxu0 %v2709_v17  ;;  %v2767_v60 = vld [vmem:[%s3646_s2 + $0xb0] ss:$8 sps:$4 sm:$0xff]   ;;  %v2772_v61 = vld [vmem:[%s3646_s2 + $0xc4] ss:$8 sps:$4 sm:$0xff]   ;;  %v2770_v62 = vld [vmem:[%s3646_s2 + $0xc0] ss:$8 sps:$4 sm:$0xff]  }
  0x25   : > { %684 = vmatprep.subr.bf16.mxu0 %v2711_v18  ;;  %736 = vmatpush1.bf16.msra.mxu1 %v2714_v19  ;;  %v2775_v63 = vld [vmem:[%s3646_s2 + $0xd4] ss:$8 sps:$4 sm:$0xff]   ;;  %v2773_v0 = vld [vmem:[%s3646_s2 + $0xd0] ss:$8 sps:$4 sm:$0xff]   ;;  %v2778_v1 = vld [vmem:[%s3646_s2 + $0xe4] ss:$8 sps:$4 sm:$0xff]  }
  0x26   : > { %737 = vmatprep.subr.bf16.mxu1 %v2988_v2  ;;  %v2776_v3 = vld [vmem:[%s3646_s2 + $0xe0] ss:$8 sps:$4 sm:$0xff]   ;;  %v2781_v4 = vld [vmem:[%s3646_s2 + $0xf4] ss:$8 sps:$4 sm:$0xff]   ;;  %v2779_v5 = vld [vmem:[%s3646_s2 + $0xf0] ss:$8 sps:$4 sm:$0xff]  }
  0x27   : > { %v2784_v6 = vld [vmem:[%s3646_s2 + $0x104] ss:$8 sps:$4 sm:$0xff]   ;;  %v3335_v12 = vshrl.u32 %v465_v11, 7  ;;  %v463_v14 = vld [vmem:[%s3655_s11] sm:$0x7]  ;;  %s2312_s20 = sshll.u32 %s407_s19, 5 }
  0x28   : > { %685 = vmatpush1.bf16.msra.mxu0 %v2713_v20  ;;  %v2800_v7 = vld [vmem:[%s3647_s3] sm:$0xff]   ;;  %s409_s29 = scalar_lea.vmem [#allocation2], %s2312_s20  ;;  %s2508_s28 = sshll.u32 %s3078_s25, 9 }
  0x29   : > { %686 = vmatprep.subr.bf16.mxu0 %v2715_v22  ;;  %738 = vmatpush1.bf16.msra.mxu1 %v2718_v23  ;;  %v467_v13 = vsub.s32 0, %v3335_v12  ;;  %v471_v15 = vsub.s32 1, %v3335_v12  ;;  %v475_v16 = vsub.s32 2, %v3335_v12  ;;  %s2246_s15 = sshll.u32 %s409_s29, 4  ;;  %s3601_s18 = scalar_lea.hbm %s3656_s12, %s2508_s28  ;;  %s3596_s15 = int_to_ptr.vmem [resolvable:$true] %s2246_s15 }
  0x2a   : > { %739 = vmatprep.subr.bf16.mxu1 %v2988_v2  ;;  %s3603_s25 = scalar_lea.sflag [#allocation3], %s407_s19  ;;  %s2924_s23 = scalar_lea.vmem %s3596_s15, 512 }
  0x2b   : > { %v468_v17 = vrot.slane %v463_v14, %v467_v13  ;;  %v472_v18 = vrot.slane %v463_v14, %v471_v15  ;;  %v476_v19 = vrot.slane %v463_v14, %v475_v16  ;;  %p2925_p11 = scmp.ne.s32.totalorder %s3596_s15, %s2924_s23  ;;  %s2989_s20 = smov [#allocation2]  }
  0x2c   : > { %687 = vmatpush1.bf16.msra.mxu0 %v2717_v24  ;;  %s2928_s26 = sshll.u32 %s2989_s20, 4  ;;  %s2929_s26 = int_to_ptr.vmem [resolvable:$false] %s2928_s26 }
  0x2d   : > { %688 = vmatprep.subr.bf16.mxu0 %v2719_v25  ;;  %740 = vmatpush1.bf16.msra.mxu1 %v2722_v26  ;;  %p2926_p12 = pnand %p2925_p11, %p3095_p5  ;;  %s2930_s16 = scalar_lea.vmem %s2929_s26, 1024 }
  0x2e   : > { %741 = vmatprep.subr.bf16.mxu1 %v2988_v2  ;;  %p2931_p0 = scmp.lt.s32.totalorder %s3596_s15, %s2929_s26  ;;  %p2932_p1 = scmp.lt.s32.totalorder %s2930_s16, %s2924_s23 }
  0x2f   : > { %p2927_p13 = pneg %p2926_p12 }
  0x30   : > { %689 = vmatpush1.bf16.msra.mxu0 %v2721_v27  ;;  %p2933_p2 = por %p2932_p1, %p2931_p0 }
  0x31   : > { %2350 = vmatprep.subr.msk.bf16.mxu0 %vm662_vm1, %v2723_v28  ;;  %742 = vmatpush1.bf16.msra.mxu1 %v2729_v30 }
  0x32   : > { %743 = vmatprep.subr.bf16.mxu1 %v2988_v2  ;;  %p2934_p3 = pnand %p2933_p2, %p2927_p13 }
  0x34   : > { %691 = vmatpush1.bf16.msra.mxu0 %v664_v32 }
  0x35   : > { %1135 = vmatprep.subr.bf16.mxu0 %v2736_v33  ;;  %744 = vmatpush1.bf16.msra.mxu1 %v670_v35 }
  0x36   : > { %1395 = vmatprep.subr.bf16.mxu1 %v2988_v2 }
  0x37   : > { %705 = vmatmul.mubr.bf16.vlgmr.msra.gmra.mrb[0].mxu0 %v2726_v34 }
  0x38   : > { %2352 = vmatprep.mubr.msk.bf16.mxu0 %vm655_vm0, %v2731_v36  ;;  %1136 = vmatpush1.bf16.msra.mxu0 %v2734_v37 }
  0x39   : > { %758 = vmatmul.mubr.bf16.vlgmr.msra.gmra.mrb[0].mxu1 %v2726_v34  ;;  %1137 = vmatprep.subr.bf16.mxu0 %v2739_v38 }
  0x3a   : > { %2354 = vmatprep.mubr.msk.bf16.mxu1 %vm655_vm0, %v2731_v36  ;;  %1396 = vmatpush1.bf16.msra.mxu1 %v2800_v7 }
  0x3b   : > { %1397 = vmatprep.subr.bf16.mxu1 %v2988_v2 }
  0x3c   : > { %1138 = vmatpush1.bf16.msra.mxu0 %v2737_v39 }
  0x3d   : > { %1139 = vmatprep.subr.bf16.mxu0 %v2742_v40 }
  0x3e   : > { %1398 = vmatpush1.bf16.msra.mxu1 %v2801_v8 }
  0x3f   : > { %715 = vmatmul.mubr.bf16.gmra.mrb[4].mxu0 %v2733_v41  ;;  %1399 = vmatprep.subr.bf16.mxu1 %v2988_v2 }
  0x40   : > { %1140 = vmatpush1.bf16.msra.mxu0 %v2740_v42 }
  0x41   : > { %766 = vmatmul.mubr.bf16.gmra.mrb[4].mxu1 %v2733_v41  ;;  %1141 = vmatprep.subr.bf16.mxu0 %v2745_v43 }
  0x42   : > { %1400 = vmatpush1.bf16.msra.mxu1 %v2802_v9 }
  0x43   : > { %1401 = vmatprep.subr.bf16.mxu1 %v2988_v2 }
  0x44   : > { %1142 = vmatpush1.bf16.msra.mxu0 %v2743_v44 }
  0x45   : > { %1143 = vmatprep.subr.bf16.mxu0 %v2748_v45 }
  0x46   : > { %1402 = vmatpush1.bf16.msra.mxu1 %v2803_v10 }
  0x47   : > { %1403 = vmatprep.subr.bf16.mxu1 %v2988_v2 }
  0x48   : > { %1144 = vmatpush1.bf16.msra.mxu0 %v2746_v46 }
  0x49   : > { %1145 = vmatprep.subr.bf16.mxu0 %v2751_v47 }
  0x4c   : > { %1146 = vmatpush1.bf16.msra.mxu0 %v2749_v48 }
  0x4d   : > { %1147 = vmatprep.subr.bf16.mxu0 %v2754_v49 }
  0x50   : > { %1148 = vmatpush1.bf16.msra.mxu0 %v2752_v50 }
  0x51   : > { %1149 = vmatprep.subr.bf16.mxu0 %v2757_v51 }
  0x54   : > { %1150 = vmatpush1.bf16.msra.mxu0 %v2755_v52 }
  0x55   : > { %1151 = vmatprep.subr.bf16.mxu0 %v2760_v53 }
  0x58   : > { %1152 = vmatpush1.bf16.msra.mxu0 %v2758_v54 }
  0x59   : > { %1153 = vmatprep.subr.bf16.mxu0 %v2763_v55 }
  0x5c   : > { %1154 = vmatpush1.bf16.msra.mxu0 %v2761_v56 }
  0x5d   : > { %1155 = vmatprep.subr.bf16.mxu0 %v2766_v57 }
  0x60   : > { %1156 = vmatpush1.bf16.msra.mxu0 %v2764_v58 }
  0x61   : > { %1157 = vmatprep.subr.bf16.mxu0 %v2769_v59 }
  0x64   : > { %1158 = vmatpush1.bf16.msra.mxu0 %v2767_v60 }
  0x65   : > { %1159 = vmatprep.subr.bf16.mxu0 %v2772_v61 }
  0x68   : > { %1160 = vmatpush1.bf16.msra.mxu0 %v2770_v62 }
  0x69   : > { %1161 = vmatprep.subr.bf16.mxu0 %v2775_v63 }
  0x6c   : > { %1162 = vmatpush1.bf16.msra.mxu0 %v2773_v0 }
  0x6d   : > { %1163 = vmatprep.subr.bf16.mxu0 %v2778_v1 }
  0x70   : > { %1164 = vmatpush1.bf16.msra.mxu0 %v2776_v3 }
  0x71   : > { %1165 = vmatprep.subr.bf16.mxu0 %v2781_v4 }
  0x74   : > { %1166 = vmatpush1.bf16.msra.mxu0 %v2779_v5 }
  0x75   : > { %1188 = vmatprep.subr.bf16.mxu0 %v2784_v6 }
 0x10a   : > { %v706_v20 = vpop.f32.mrb[0].mxu0 }
 0x10b   : > { %v3347_v21 = vadd.f32 %v706_v20, %v468_v17  ;;  %v708_v22 = vpop.f32.mrb[1].mxu0 }
 0x10c   : > { %v3349_v23 = vadd.f32 %v708_v22, %v472_v18  ;;  %v710_v24 = vpop.f32.mrb[2].mxu0  ;;  %v759_v25 = vpop.f32.mrb[0].mxu1 }
 0x10d   : > { %v786_v26 = vmin.f32 %v3347_v21, 0.0  ;;  %v3352_v27 = vadd.f32 %v710_v24, %v468_v17  ;;  %v712_v28 = vpop.f32.mrb[3].mxu0  ;;  %v3354_v29 = vadd.f32 %v759_v25, %v476_v19  ;;  %v761_v30 = vpop.f32.mrb[1].mxu1  ;;  %vm774_vm2 = vcmp.gt.f32.partialorder %v3347_v21, 0.0 }
 0x10e   : > { %v787_v31 = vmin.f32 %v3349_v23, 0.0  ;;  %v3357_v32 = vadd.f32 %v712_v28, %v472_v18  ;;  %v762_v33 = vpop.f32.mrb[2].mxu1  ;;  %vm775_vm3 = vcmp.gt.f32.partialorder %v3349_v23, 0.0 }
 0x10f   : > { %v798_v34 = vmul.f32 1.442695, %v786_v26  ;;  %v789_v35 = vmin.f32 %v3352_v27, 0.0  ;;  %v764_v36 = vpop.f32.mrb[3].mxu1  ;;  %v788_v39 = vmin.f32 %v3354_v29, 0.0  ;;  %v3362_v41 = vadd.f32 %v762_v33, %v476_v19 }
 0x110   : > { %v800_v37 = vmul.f32 1.442695, %v787_v31  ;;  %v790_v38 = vmin.f32 %v3357_v32, 0.0  ;;  %vm777_vm4 = vcmp.gt.f32.partialorder %v3352_v27, 0.0  ;;  %vm776_vm5 = vcmp.gt.f32.partialorder %v3354_v29, 0.0 }
 0x111   : > { %2836 = vpow2.f32 %v798_v34  ;;  %v804_v40 = vmul.f32 1.442695, %v789_v35  ;;  %v802_v43 = vmul.f32 1.442695, %v788_v39  ;;  %v791_v46 = vmin.f32 %v3362_v41, 0.0 }
 0x112   : > { %2838 = vpow2.f32 %v800_v37  ;;  %v806_v42 = vmul.f32 1.442695, %v790_v38  ;;  %v716_v44 = vpop.f32.mrb[4].mxu0  ;;  %vm778_vm6 = vcmp.gt.f32.partialorder %v3357_v32, 0.0  ;;  %vm779_vm7 = vcmp.gt.f32.partialorder %v3362_v41, 0.0 }
 0x113   : > { %2840 = vpow2.f32 %v804_v40  ;;  %v3364_v45 = vadd.f32 %v716_v44, %v468_v17  ;;  %v718_v47 = vpop.f32.mrb[5].mxu0  ;;  %v808_v52 = vmul.f32 1.442695, %v791_v46  ;;  %v2787_v36 = vld [vmem:[%s3646_s2 + $0x114] ss:$8 sps:$4 sm:$0xff]  }
 0x114   : > { %2842 = vpow2.f32 %v806_v42  ;;  %v3367_v48 = vadd.f32 %v718_v47, %v472_v18  ;;  %v720_v49 = vpop.f32.mrb[6].mxu0  ;;  %v767_v50 = vpop.f32.mrb[4].mxu1  ;;  %v2785_v40 = vld [vmem:[%s3646_s2 + $0x110] ss:$8 sps:$4 sm:$0xff]  }
 0x115   : > { %2844 = vpow2.f32 %v802_v43  ;;  %v792_v51 = vmin.f32 %v3364_v45, 0.0  ;;  %v722_v53 = vpop.f32.mrb[7].mxu0  ;;  %v769_v54 = vpop.f32.mrb[5].mxu1  ;;  %v3371_v56 = vadd.f32 %v720_v49, %v468_v17  ;;  %v3375_v60 = vadd.f32 %v767_v50, %v476_v19 }
 0x116   : > { %v793_v55 = vmin.f32 %v3367_v48, 0.0  ;;  %v3373_v57 = vadd.f32 %v722_v53, %v472_v18  ;;  %v770_v58 = vpop.f32.mrb[6].mxu1  ;;  %2846 = vpow2.f32 %v808_v52  ;;  %vm780_vm8 = vcmp.gt.f32.partialorder %v3364_v45, 0.0 }
 0x117   : > { %v810_v59 = vmul.f32 1.442695, %v792_v51  ;;  %v3377_v61 = vadd.f32 %v770_v58, %v476_v19  ;;  %v772_v62 = vpop.f32.mrb[7].mxu1  ;;  %v795_v0 = vmin.f32 %v3371_v56, 0.0  ;;  %v794_v3 = vmin.f32 %v3375_v60, 0.0 }
 0x118   : > { %v812_v63 = vmul.f32 1.442695, %v793_v55  ;;  %v796_v1 = vmin.f32 %v3373_v57, 0.0  ;;  %vm781_vm9 = vcmp.gt.f32.partialorder %v3367_v48, 0.0  ;;  %vm783_vm10 = vcmp.gt.f32.partialorder %v3371_v56, 0.0 }
 0x119   : > { %2848 = vpow2.f32 %v810_v59  ;;  %v816_v4 = vmul.f32 1.442695, %v795_v0  ;;  %v797_v5 = vmin.f32 %v3377_v61, 0.0  ;;  %v814_v8 = vmul.f32 1.442695, %v794_v3  ;;  %v2805_v3 = vld [vmem:[%s3647_s3 + $0x28] sm:$0xff]  }
 0x11a   : > { %2850 = vpow2.f32 %v812_v63  ;;  %v818_v7 = vmul.f32 1.442695, %v796_v1  ;;  %vm784_vm11 = vcmp.gt.f32.partialorder %v3373_v57, 0.0  ;;  %vm782_vm12 = vcmp.gt.f32.partialorder %v3375_v60, 0.0  ;;  %v2788_v62 = vld [vmem:[%s3646_s2 + $0x120] ss:$8 sps:$4 sm:$0xff]  }
 0x11b   : > { %v2837_v6 = vpop.eup %2836  ;;  %2852 = vpow2.f32 %v816_v4  ;;  %v820_v11 = vmul.f32 1.442695, %v797_v5  ;;  %vm785_vm13 = vcmp.gt.f32.partialorder %v3377_v61, 0.0  ;;  %v2797_v0 = vld [vmem:[%s3646_s2 + $0x150] ss:$8 sps:$4 sm:$0xff]   ;;  %v2804_v1 = vld [vmem:[%s3647_s3 + $0x20] sm:$0xff]  }
 0x11c   : > { %v2839_v9 = vpop.eup %2838  ;;  %v2355_v10 = vadd.f32 -1.0, %v2837_v6  ;;  %2854 = vpow2.f32 %v818_v7  ;;  %1404 = vmatpush1.bf16.msra.mxu1 %v2804_v1  ;;  %v2806_v4 = vld [vmem:[%s3647_s3 + $0x30] sm:$0xff]   ;;  %v2807_v5 = vld [vmem:[%s3647_s3 + $0x38] sm:$0xff]   ;;  %v2808_v6 = vld [vmem:[%s3647_s3 + $0x40] sm:$0xff]  }
 0x11d   : > { %v2841_v14 = vpop.eup %2840  ;;  %v2356_v16 = vadd.f32 -1.0, %v2839_v9  ;;  %2856 = vpow2.f32 %v814_v8  ;;  %1405 = vmatprep.subr.bf16.mxu1 %v2988_v2  ;;  %v2809_v7 = vld [vmem:[%s3647_s3 + $0x48] sm:$0xff]   ;;  %v2810_v8 = vld [vmem:[%s3647_s3 + $0x50] sm:$0xff]   ;;  %v896_v9 = vld [vmem:[%s3655_s11 + $0x3] sm:$0x3] }
 0x11e   : > { %v2843_v17 = vpop.eup %2842  ;;  %v2358_v18 = vadd.f32 -1.0, %v2841_v14  ;;  %2858 = vpow2.f32 %v820_v11  ;;  %v834_v22 = vsel %vm774_vm2, %v3347_v21, %v2355_v10  ;;  %v2782_v21 = vld [vmem:[%s3646_s2 + $0x100] ss:$8 sps:$4 sm:$0xff]   ;;  %v901_v10 = vrot.slane %v896_v9, %v467_v13 }
 0x11f   : > { %v2845_v19 = vpop.eup %2844  ;;  %v2359_v20 = vadd.f32 -1.0, %v2843_v17  ;;  %v835_v30 = vsel %vm775_vm3, %v3349_v23, %v2356_v16  ;;  %v905_v11 = vrot.slane %v896_v9, %v471_v15  ;;  %vm1388_vm3 = vcmask 392192   ;;  %v2812_v9 = vld [vmem:[%s3648_s4 + $0x8] sm:$0xff]  }
 0x120   : > { %v837_v24 = vsel %vm777_vm4, %v3352_v27, %v2358_v18  ;;  %v2357_v25 = vadd.f32 -1.0, %v2845_v19  ;;  %v2847_v26 = vpop.eup %2846  ;;  %1406 = vmatpush1.bf16.msra.mxu1 %v2805_v3 }
 0x121   : > { %v846_v28 = vpack.c.bf16 %v837_v24, %v834_v22  ;;  %v838_v31 = vsel %vm778_vm6, %v3357_v32, %v2359_v20  ;;  %v2360_v34 = vadd.f32 -1.0, %v2847_v26  ;;  %1407 = vmatprep.subr.bf16.mxu1 %v2988_v2 }
 0x122   : > { %v836_v33 = vsel %vm776_vm5, %v3354_v29, %v2357_v25  ;;  %v847_v35 = vpack.c.bf16 %v838_v31, %v835_v30 }
 0x123   : > { %v2849_v27 = vpop.eup %2848  ;;  %v839_v38 = vsel %vm779_vm7, %v3362_v41, %v2360_v34  ;;  %v2790_v41 = vld [vmem:[%s3646_s2 + $0x124] ss:$8 sps:$4 sm:$0xff]  }
 0x124   : > { %v2851_v37 = vpop.eup %2850  ;;  %1167 = vmatprep.mubr.bf16.mxu0 %v847_v35  ;;  %v2361_v23 = vadd.f32 -1.0, %v2849_v27  ;;  %v848_v39 = vpack.c.bf16 %v839_v38, %v836_v33  ;;  %1408 = vmatpush1.bf16.msra.mxu1 %v2806_v4 }
 0x125   : > { %1168 = vmatmul.mubr.bf16.vlgmr.msra.gmra.mrb[8].mxu0 %v846_v28  ;;  %v2853_v32 = vpop.eup %2852  ;;  %v2362_v29 = vadd.f32 -1.0, %v2851_v37  ;;  %1409 = vmatprep.subr.bf16.mxu1 %v2988_v2 }
 0x126   : > { %1189 = vmatpush1.bf16.msra.mxu0 %v2782_v21  ;;  %v2855_v42 = vpop.eup %2854  ;;  %v2364_v43 = vadd.f32 -1.0, %v2853_v32  ;;  %v840_v50 = vsel %vm780_vm8, %v3364_v45, %v2361_v23 }
 0x127   : > { %1190 = vmatprep.subr.bf16.mxu0 %v2787_v36  ;;  %v2857_v44 = vpop.eup %2856  ;;  %v2365_v46 = vadd.f32 -1.0, %v2855_v42  ;;  %v841_v53 = vsel %vm781_vm9, %v3367_v48, %v2362_v29  ;;  %v2791_v48 = vld [vmem:[%s3646_s2 + $0x130] ss:$8 sps:$4 sm:$0xff]  }
 0x128   : > { %v2859_v47 = vpop.eup %2858  ;;  %v2363_v49 = vadd.f32 -1.0, %v2857_v44  ;;  %v843_v51 = vsel %vm783_vm10, %v3371_v56, %v2364_v43  ;;  %v2793_v56 = vld [vmem:[%s3646_s2 + $0x134] ss:$8 sps:$4 sm:$0xff]   ;;  %1410 = vmatpush1.bf16.msra.mxu1 %v2807_v5 }
 0x129   : > { %v2366_v52 = vadd.f32 -1.0, %v2859_v47  ;;  %v844_v54 = vsel %vm784_vm11, %v3373_v57, %v2365_v46  ;;  %v849_v55 = vpack.c.bf16 %v843_v51, %v840_v50  ;;  %v2796_v57 = vld [vmem:[%s3646_s2 + $0x144] ss:$8 sps:$4 sm:$0xff]   ;;  %1411 = vmatprep.subr.bf16.mxu1 %v2988_v2 }
 0x12a   : > { %1191 = vmatpush1.bf16.msra.mxu0 %v2785_v40  ;;  %v842_v58 = vsel %vm782_vm12, %v3375_v60, %v2363_v49  ;;  %v850_v59 = vpack.c.bf16 %v844_v54, %v841_v53  ;;  %v2794_v60 = vld [vmem:[%s3646_s2 + $0x140] ss:$8 sps:$4 sm:$0xff]  }
 0x12b   : > { %1192 = vmatprep.subr.bf16.mxu0 %v2790_v41  ;;  %v845_v45 = vsel %vm785_vm13, %v3377_v61, %v2366_v52  ;;  %v2799_v61 = vld [vmem:[%s3646_s2 + $0x154] ss:$8 sps:$4 sm:$0xff]  }
 0x12c   : > { %v851_v63 = vpack.c.bf16 %v845_v45, %v842_v58  ;;  %1177 = vmatprep.mubr.bf16.mxu0 %v850_v59  ;;  %1412 = vmatpush1.bf16.msra.mxu1 %v2808_v6 }
 0x12d   : > { %1178 = vmatmul.mubr.bf16.gmra.mrb[12].mxu0 %v849_v55  ;;  %1413 = vmatprep.subr.bf16.mxu1 %v2988_v2 }
 0x12e   : > { %1193 = vmatpush1.bf16.msra.mxu0 %v2788_v62  ;;  %1220 = vmatprep.mubr.bf16.mxu0 %v2988_v2 }
 0x12f   : > { %1194 = vmatprep.subr.bf16.mxu0 %v2793_v56 }
 0x130   : > { %1414 = vmatpush1.bf16.msra.mxu1 %v2809_v7 }
 0x131   : > { %1415 = vmatprep.subr.bf16.mxu1 %v2988_v2 }
 0x132   : > { %1195 = vmatpush1.bf16.msra.mxu0 %v2791_v48 }
 0x133   : > { %1196 = vmatprep.subr.bf16.mxu0 %v2796_v57 }
 0x134   : > { %1416 = vmatpush1.bf16.msra.mxu1 %v2810_v8  ;;  %v2811_v8 = vld [vmem:[%s3648_s4] sm:$0xff]  }
 0x135   : > { %2548 = vmatprep.subr.bf16.mxu1 %v2811_v8 }
 0x136   : > { %1197 = vmatpush1.bf16.msra.mxu0 %v2794_v60 }
 0x137   : > { %1198 = vmatprep.subr.bf16.mxu0 %v2799_v61 }
 0x13a   : > { %1199 = vmatpush1.bf16.msra.mxu0 %v2797_v0 }
 0x13d   : > { %2411 = vmatmul.mubr.msk.bf16.vlgmr.msra.gmra.mrb[8].mxu0 %vm1128_vm14, %v848_v39 }
 0x13e   : > { %1230 = vmatprep.mubr.bf16.mxu0 %v2988_v2 }
 0x145   : > { %2412 = vmatmul.mubr.msk.bf16.gmra.mrb[12].mxu0 %vm1128_vm14, %v851_v63 }
 0x210   : > { %v1222_v14 = vpop.f32.mrb[8].mxu0 }
 0x211   : > { %v2626_v16 = vadd.f32 %v1222_v14, %v901_v10  ;;  %v1224_v17 = vpop.f32.mrb[9].mxu0  ;;  %v2815_v14 = vld [vmem:[%s3648_s4 + $0x20] sm:$0xff]  }
 0x212   : > { %v2627_v18 = vadd.f32 %v1224_v17, %v905_v11  ;;  %v1226_v2 = vpop.f32.mrb[10].mxu0  ;;  %v2817_v17 = vld [vmem:[%s3648_s4 + $0x30] sm:$0xff]  }
 0x213   : > { %v1249_v19 = vmin.f32 %v2626_v16, 0.0  ;;  %v2628_v20 = vadd.f32 %v1226_v2, %v901_v10  ;;  %v1228_v22 = vpop.f32.mrb[11].mxu0  ;;  %vm1241_vm15 = vcmp.gt.f32.partialorder %v2626_v16, 0.0  ;;  %v2421_v2 = vld [vmem:[%s3655_s11 + $0x5] ss:$0 sm:$0xff] }
 0x214   : > { %v1250_v24 = vmin.f32 %v2627_v18, 0.0  ;;  %v2629_v25 = vadd.f32 %v1228_v22, %v905_v11  ;;  %vm1242_vm1 = vcmp.gt.f32.partialorder %v2627_v18, 0.0 }
 0x215   : > { %v1257_v26 = vmul.f32 1.442695, %v1249_v19  ;;  %v1251_v28 = vmin.f32 %v2628_v20, 0.0  ;;  %vm1243_vm0 = vcmp.gt.f32.partialorder %v2628_v20, 0.0 }
 0x216   : > { %v1259_v30 = vmul.f32 1.442695, %v1250_v24  ;;  %v1252_v31 = vmin.f32 %v2629_v25, 0.0  ;;  %vm1244_vm2 = vcmp.gt.f32.partialorder %v2629_v25, 0.0 }
 0x217   : > { %2860 = vpow2.f32 %v1257_v26  ;;  %v1261_v33 = vmul.f32 1.442695, %v1251_v28 }
 0x218   : > { %2862 = vpow2.f32 %v1259_v30  ;;  %v1263_v13 = vmul.f32 1.442695, %v1252_v31  ;;  %v1232_v12 = vpop.f32.mrb[12].mxu0 }
 0x219   : > { %2864 = vpow2.f32 %v1261_v33  ;;  %v2630_v15 = vadd.f32 %v1232_v12, %v901_v10  ;;  %v1234_v34 = vpop.f32.mrb[13].mxu0 }
 0x21a   : > { %2866 = vpow2.f32 %v1263_v13  ;;  %v2631_v35 = vadd.f32 %v1234_v34, %v905_v11  ;;  %v1236_v21 = vpop.f32.mrb[14].mxu0 }
 0x21b   : > { %v1253_v27 = vmin.f32 %v2630_v15, 0.0  ;;  %v2632_v36 = vadd.f32 %v1236_v21, %v901_v10  ;;  %v1238_v37 = vpop.f32.mrb[15].mxu0  ;;  %vm1245_vm4 = vcmp.gt.f32.partialorder %v2630_v15, 0.0  ;;  %v2813_v10 = vld [vmem:[%s3648_s4 + $0x10] sm:$0xff]  }
 0x21c   : > { %v1254_v38 = vmin.f32 %v2631_v35, 0.0  ;;  %v2633_v23 = vadd.f32 %v1238_v37, %v905_v11  ;;  %vm1246_vm6 = vcmp.gt.f32.partialorder %v2631_v35, 0.0  ;;  %v2814_v11 = vld [vmem:[%s3648_s4 + $0x18] sm:$0xff]  }
 0x21d   : > { %v1265_v39 = vmul.f32 1.442695, %v1253_v27  ;;  %v1255_v32 = vmin.f32 %v2632_v36, 0.0  ;;  %vm1247_vm5 = vcmp.gt.f32.partialorder %v2632_v36, 0.0 }
 0x21e   : > { %v1267_v29 = vmul.f32 1.442695, %v1254_v38  ;;  %v1256_v40 = vmin.f32 %v2633_v23, 0.0  ;;  %vm1248_vm7 = vcmp.gt.f32.partialorder %v2633_v23, 0.0 }
 0x21f   : > { %2868 = vpow2.f32 %v1265_v39  ;;  %v1269_v42 = vmul.f32 1.442695, %v1255_v32 }
 0x220   : > { %2870 = vpow2.f32 %v1267_v29  ;;  %v1271_v43 = vmul.f32 1.442695, %v1256_v40 }
 0x221   : > { %v2861_v41 = vpop.eup %2860  ;;  %2872 = vpow2.f32 %v1269_v42 }
 0x222   : > { %v2863_v44 = vpop.eup %2862  ;;  %v2413_v46 = vadd.f32 -1.0, %v2861_v41  ;;  %2874 = vpow2.f32 %v1271_v43 }
 0x223   : > { %v2865_v47 = vpop.eup %2864  ;;  %v2414_v49 = vadd.f32 -1.0, %v2863_v44 }
 0x224   : > { %v2867_v50 = vpop.eup %2866  ;;  %v2415_v51 = vadd.f32 -1.0, %v2865_v47  ;;  %v1281_v53 = vsel %vm1241_vm15, %v2626_v16, %v2413_v46  ;;  %v2816_v16 = vld [vmem:[%s3648_s4 + $0x28] sm:$0xff]  }
 0x225   : > { %v2416_v52 = vadd.f32 -1.0, %v2867_v50  ;;  %v1282_v55 = vsel %vm1242_vm1, %v2627_v18, %v2414_v49  ;;  %v2818_v18 = vld [vmem:[%s3648_s4 + $0x38] sm:$0xff]  }
 0x226   : > { %v1283_v54 = vsel %vm1243_vm0, %v2628_v20, %v2415_v51  ;;  %vm1655_vm0 = vcmask 523264  }
 0x227   : > { %v3478_v58 = vpack.c.bf16 %v1283_v54, %v1281_v53  ;;  %v1284_v59 = vsel %vm1244_vm2, %v2629_v25, %v2416_v52  ;;  %v2819_v52 = vld [vmem:[%s3649_s5] sm:$0xff]   ;;  %v2820_v53 = vld [vmem:[%s3649_s5 + $0x8] sm:$0xff]   ;;  %v2821_v54 = vld [vmem:[%s3649_s5 + $0x10] sm:$0xff]  }
 0x228   : > { %v1290_v62 = vpack.c.bf16 %v1284_v59, %v1282_v55  ;;  %v2822_v55 = vld [vmem:[%s3649_s5 + $0x18] sm:$0xff]   ;;  %v2439_v59 = vld [vmem:[%s3655_s11 + $0x6] ss:$0 sm:$0xff] }
 0x229   : > { %v2869_v45 = vpop.eup %2868 }
 0x22a   : > { %v2871_v56 = vpop.eup %2870  ;;  %v2417_v63 = vadd.f32 -1.0, %v2869_v45  ;;  %2433 = vmatprep.mubr.msk.bf16.mxu1 %vm1388_vm3, %v1290_v62 }
 0x22b   : > { %v2873_v48 = vpop.eup %2872  ;;  %v2418_v57 = vadd.f32 -1.0, %v2871_v56  ;;  %1428 = vmatmul.mubr.bf16.vlgmr.msra.gmra.mrb[8].mxu1 %v3478_v58 }
 0x22c   : > { %v2875_v60 = vpop.eup %2874  ;;  %v2419_v61 = vadd.f32 -1.0, %v2873_v48  ;;  %v1285_v1 = vsel %vm1245_vm4, %v2630_v15, %v2417_v63  ;;  %2549 = vmatpush3.bf16.msra.mxu1 %v2811_v8 }
 0x22d   : > { %v2420_v0 = vadd.f32 -1.0, %v2875_v60  ;;  %v1286_v4 = vsel %vm1246_vm6, %v2631_v35, %v2418_v57  ;;  %2550 = vmatprep.subr.bf16.mxu1 %v2812_v9 }
 0x22e   : > { %v1287_v3 = vsel %vm1247_vm5, %v2632_v36, %v2419_v61 }
 0x22f   : > { %v1288_v5 = vsel %vm1248_vm7, %v2633_v23, %v2420_v0  ;;  %v3482_v6 = vpack.c.bf16 %v1287_v3, %v1285_v1 }
 0x230   : > { %v1292_v7 = vpack.c.bf16 %v1288_v5, %v1286_v4  ;;  %2551 = vmatpush3.bf16.msra.mxu1 %v2812_v9 }
 0x231   : > { %2552 = vmatprep.subr.bf16.mxu1 %v2813_v10 }
 0x232   : > { %2434 = vmatprep.mubr.msk.bf16.mxu1 %vm1388_vm3, %v1292_v7 }
 0x233   : > { %1436 = vmatmul.mubr.bf16.gmra.mrb[12].mxu1 %v3482_v6 }
 0x234   : > { %2553 = vmatpush3.bf16.msra.mxu1 %v2813_v10 }
 0x235   : > { %2554 = vmatprep.subr.bf16.mxu1 %v2814_v11 }
 0x238   : > { %2555 = vmatpush3.bf16.msra.mxu1 %v2814_v11 }
 0x239   : > { %2556 = vmatprep.subr.bf16.mxu1 %v2815_v14 }
 0x23c   : > { %2557 = vmatpush3.bf16.msra.mxu1 %v2815_v14 }
 0x23d   : > { %2558 = vmatprep.subr.bf16.mxu1 %v2816_v16 }
 0x240   : > { %2559 = vmatpush3.bf16.msra.mxu1 %v2816_v16 }
 0x241   : > { %2560 = vmatprep.subr.bf16.mxu1 %v2817_v17 }
 0x244   : > { %2561 = vmatpush3.bf16.msra.mxu1 %v2817_v17 }
 0x245   : > { %2562 = vmatprep.subr.bf16.mxu1 %v2818_v18 }
 0x248   : > { %2563 = vmatpush3.bf16.msra.mxu1 %v2818_v18 }
 0x249   : > { %2568 = vmatprep.subr.bf16.mxu1 %v2819_v52 }
 0x2fe   : > { %v1429_v19 = vpop.f32.mrb[8].mxu1 }
 0x2ff   : > { %v1430_v20 = vadd.f32 %v2421_v2, %v1429_v19  ;;  %v1431_v22 = vpop.f32.mrb[9].mxu1 }
 0x300   : > { %v1432_v24 = vpop.f32.mrb[10].mxu1 }
 0x301   : > { %v1448_v25 = vmin.f32 %v1430_v20, 0.0  ;;  %v1433_v26 = vadd.f32 %v2421_v2, %v1432_v24  ;;  %v1434_v28 = vpop.f32.mrb[11].mxu1  ;;  %vm1444_vm8 = vcmp.gt.f32.partialorder %v1430_v20, 0.0 }
 0x303   : > { %v1452_v30 = vmul.f32 1.442695, %v1448_v25  ;;  %v1449_v31 = vmin.f32 %v1433_v26, 0.0  ;;  %vm1445_vm9 = vcmp.gt.f32.partialorder %v1433_v26, 0.0 }
 0x305   : > { %2876 = vpow2.f32 %v1452_v30  ;;  %v1454_v33 = vmul.f32 1.442695, %v1449_v31  ;;  %v2823_v30 = vld [vmem:[%s3650_s6] sm:$0xff]   ;;  %v2824_v31 = vld [vmem:[%s3650_s6 + $0x8] sm:$0xff]  }
 0x306   : > { %v1437_v13 = vpop.f32.mrb[12].mxu1  ;;  %2580 = vmatprep.subr.bf16.mxu0 %v2823_v30 }
 0x307   : > { %2878 = vpow2.f32 %v1454_v33  ;;  %v1438_v12 = vadd.f32 %v2421_v2, %v1437_v13  ;;  %v1439_v15 = vpop.f32.mrb[13].mxu1  ;;  %2581 = vmatpush3.bf16.msra.mxu0 %v2823_v30  ;;  %v2825_v33 = vld [vmem:[%s3650_s6 + $0x10] sm:$0xff]   ;;  %v2826_v13 = vld [vmem:[%s3650_s6 + $0x18] sm:$0xff]  }
 0x308   : > { %v1440_v34 = vpop.f32.mrb[14].mxu1  ;;  %2582 = vmatprep.subr.bf16.mxu0 %v2824_v31 }
 0x309   : > { %v1450_v35 = vmin.f32 %v1438_v12, 0.0  ;;  %v1441_v21 = vadd.f32 %v2421_v2, %v1440_v34  ;;  %v1442_v27 = vpop.f32.mrb[15].mxu1  ;;  %vm1446_vm10 = vcmp.gt.f32.partialorder %v1438_v12, 0.0 }
 0x30b   : > { %v1456_v36 = vmul.f32 1.442695, %v1450_v35  ;;  %v1451_v37 = vmin.f32 %v1441_v21, 0.0  ;;  %vm1447_vm11 = vcmp.gt.f32.partialorder %v1441_v21, 0.0  ;;  %2583 = vmatpush3.bf16.msra.mxu0 %v2824_v31 }
 0x30c   : > { %2584 = vmatprep.subr.bf16.mxu0 %v2825_v33 }
 0x30d   : > { %2880 = vpow2.f32 %v1456_v36  ;;  %v1458_v38 = vmul.f32 1.442695, %v1451_v37 }
 0x30f   : > { %v2877_v23 = vpop.eup %2876  ;;  %2882 = vpow2.f32 %v1458_v38  ;;  %2585 = vmatpush3.bf16.msra.mxu0 %v2825_v33 }
 0x310   : > { %v2435_v39 = vadd.f32 -1.0, %v2877_v23  ;;  %2586 = vmatprep.subr.bf16.mxu0 %v2826_v13 }
 0x311   : > { %v2879_v32 = vpop.eup %2878 }
 0x312   : > { %v2436_v29 = vadd.f32 -1.0, %v2879_v32  ;;  %v1464_v40 = vsel %vm1444_vm8, %v1430_v20, %v2435_v39 }
 0x313   : > { %2587 = vmatpush3.bf16.msra.mxu0 %v2826_v13 }
 0x314   : > { %v1465_v42 = vsel %vm1445_vm9, %v1433_v26, %v2436_v29  ;;  %vm1875_vm9 = vcmask 261120  }
 0x315   : > { %v1468_v43 = vpack.c.bf16 %v1465_v42, %v1464_v40 }
 0x317   : > { %v2881_v41 = vpop.eup %2880  ;;  %2564 = vmatprep.mubr.bf16.mxu1 %v1468_v43 }
 0x318   : > { %v2437_v44 = vadd.f32 -1.0, %v2881_v41 }
 0x319   : > { %v2883_v46 = vpop.eup %2882 }
 0x31a   : > { %v2438_v47 = vadd.f32 -1.0, %v2883_v46  ;;  %v1466_v49 = vsel %vm1446_vm10, %v1438_v12, %v2437_v44  ;;  %v2452_v12 = vld [vmem:[%s3655_s11 + $0x7] ss:$0 sm:$0xff]  ;;  %vm1937_vm10 = vcmask 130048  }
 0x31c   : > { %v1467_v50 = vsel %vm1447_vm11, %v1441_v21, %v2438_v47 }
 0x31d   : > { %v1469_v51 = vpack.c.bf16 %v1467_v50, %v1466_v49 }
 0x31f   : > { %2565 = vmatmul.mubr.bf16.vlgmr.msra.gmra.mrb[16].mxu1 %v1469_v51 }
 0x320   : > { %2569 = vmatpush3.bf16.msra.mxu1 %v2819_v52 }
 0x321   : > { %2570 = vmatprep.subr.bf16.mxu1 %v2820_v53 }
 0x324   : > { %2571 = vmatpush3.bf16.msra.mxu1 %v2820_v53 }
 0x325   : > { %2572 = vmatprep.subr.bf16.mxu1 %v2821_v54 }
 0x328   : > { %2573 = vmatpush3.bf16.msra.mxu1 %v2821_v54 }
 0x329   : > { %2574 = vmatprep.subr.bf16.mxu1 %v2822_v55 }
 0x32c   : > { %2575 = vmatpush3.bf16.msra.mxu1 %v2822_v55 }
 0x3f2   : > { %v2566_v62 = vpop.f32.mrb[16].mxu1 }
 0x3f3   : > { %v1584_v45 = vadd.f32 %v2566_v62, %v2439_v59  ;;  %v1575_v56 = vpop.f32.mrb[17].mxu1 }
 0x3f4   : > { %v1576_v63 = vadd.f32 %v2439_v59, %v1575_v56  ;;  %v2567_v48 = vpop.f32.mrb[18].mxu1 }
 0x3f5   : > { %v1596_v57 = vmin.f32 %v1584_v45, 0.0  ;;  %v1587_v60 = vadd.f32 %v2567_v48, %v2439_v59  ;;  %v1578_v61 = vpop.f32.mrb[19].mxu1  ;;  %vm1592_vm12 = vcmp.gt.f32.partialorder %v1584_v45, 0.0  ;;  %v2828_v48 = vld [vmem:[%s3652_s8 + $0x8] sm:$0xff]  }
 0x3f6   : > { %v1594_v0 = vmin.f32 %v1576_v63, 0.0  ;;  %v1579_v1 = vadd.f32 %v2439_v59, %v1578_v61  ;;  %vm1590_vm14 = vcmp.gt.f32.partialorder %v1576_v63, 0.0 }
 0x3f7   : > { %v1602_v3 = vmul.f32 1.442695, %v1596_v57  ;;  %v1597_v4 = vmin.f32 %v1587_v60, 0.0  ;;  %vm1593_vm13 = vcmp.gt.f32.partialorder %v1587_v60, 0.0  ;;  %v2829_v57 = vld [vmem:[%s3651_s7] sm:$0xff]  }
 0x3f8   : > { %v1598_v5 = vmul.f32 1.442695, %v1594_v0  ;;  %v1595_v7 = vmin.f32 %v1579_v1, 0.0  ;;  %vm1591_vm15 = vcmp.gt.f32.partialorder %v1579_v1, 0.0 }
 0x3f9   : > { %2884 = vpow2.f32 %v1602_v3  ;;  %v1604_v8 = vmul.f32 1.442695, %v1597_v4 }
 0x3fa   : > { %2886 = vpow2.f32 %v1598_v5  ;;  %v1600_v9 = vmul.f32 1.442695, %v1595_v7 }
 0x3fb   : > { %2888 = vpow2.f32 %v1604_v8 }
 0x3fc   : > { %2890 = vpow2.f32 %v1600_v9 }
 0x403   : > { %v2885_v10 = vpop.eup %2884 }
 0x404   : > { %v2887_v11 = vpop.eup %2886  ;;  %v2450_v14 = vadd.f32 -1.0, %v2885_v10 }
 0x405   : > { %v2889_v16 = vpop.eup %2888  ;;  %v2448_v17 = vadd.f32 -1.0, %v2887_v11 }
 0x406   : > { %v2891_v18 = vpop.eup %2890  ;;  %v2451_v2 = vadd.f32 -1.0, %v2889_v16  ;;  %v1612_v20 = vsel %vm1592_vm12, %v1584_v45, %v2450_v14 }
 0x407   : > { %v2449_v19 = vadd.f32 -1.0, %v2891_v18  ;;  %v1610_v24 = vsel %vm1590_vm14, %v1576_v63, %v2448_v17  ;;  %v2827_v63 = vld [vmem:[%s3652_s8] sm:$0xff]  }
 0x408   : > { %v1613_v22 = vsel %vm1593_vm13, %v1587_v60, %v2451_v2  ;;  %2592 = vmatprep.subr.bf16.mxu1 %v2827_v63  ;;  %v2463_v60 = vld [vmem:[%s3655_s11 + $0x8] ss:$0 sm:$0xff] }
 0x409   : > { %v1615_v25 = vpack.c.bf16 %v1613_v22, %v1612_v20  ;;  %v1611_v26 = vsel %vm1591_vm15, %v1579_v1, %v2449_v19 }
 0x40a   : > { %v1614_v28 = vpack.c.bf16 %v1611_v26, %v1610_v24 }
 0x40c   : > { %2576 = vmatprep.mubr.msk.bf16.mxu1 %vm1655_vm0, %v1614_v28 }
 0x40d   : > { %2577 = vmatmul.mubr.msk.bf16.vlgmr.msra.gmra.mrb[20].mxu1 %vm1655_vm0, %v1615_v25 }
 0x40e   : > { %2593 = vmatpush3.bf16.msra.mxu1 %v2827_v63 }
 0x40f   : > { %2594 = vmatprep.subr.bf16.mxu1 %v2828_v48 }
 0x412   : > { %2595 = vmatpush3.bf16.msra.mxu1 %v2828_v48 }
 0x413   : > { %2600 = vmatprep.subr.bf16.mxu1 %v2829_v57 }
 0x4e0   : > { %v2578_v15 = vpop.f32.mrb[20].mxu1 }
 0x4e1   : > { %v1705_v34 = vadd.f32 %v2578_v15, %v2452_v12  ;;  %v1696_v35 = vpop.f32.mrb[21].mxu1 }
 0x4e2   : > { %v1697_v21 = vadd.f32 %v2452_v12, %v1696_v35  ;;  %v2579_v27 = vpop.f32.mrb[22].mxu1  ;;  %v2830_v35 = vld [vmem:[%s3653_s9] sm:$0xff]  }
 0x4e3   : > { %v1717_v36 = vmin.f32 %v1705_v34, 0.0  ;;  %v1708_v37 = vadd.f32 %v2579_v27, %v2452_v12  ;;  %v1699_v38 = vpop.f32.mrb[23].mxu1  ;;  %vm1713_vm1 = vcmp.gt.f32.partialorder %v1705_v34, 0.0  ;;  %2606 = vmatprep.subr.bf16.mxu0 %v2830_v35  ;;  %v2832_v27 = vld [vmem:[%s3653_s9 + $0x10] sm:$0xff]  }
 0x4e4   : > { %v1715_v23 = vmin.f32 %v1697_v21, 0.0  ;;  %v1700_v39 = vadd.f32 %v2452_v12, %v1699_v38  ;;  %vm1711_vm3 = vcmp.gt.f32.partialorder %v1697_v21, 0.0 }
 0x4e5   : > { %v1723_v32 = vmul.f32 1.442695, %v1717_v36  ;;  %v1718_v29 = vmin.f32 %v1708_v37, 0.0  ;;  %vm1714_vm2 = vcmp.gt.f32.partialorder %v1708_v37, 0.0 }
 0x4e6   : > { %v1719_v40 = vmul.f32 1.442695, %v1715_v23  ;;  %v1716_v42 = vmin.f32 %v1700_v39, 0.0  ;;  %vm1712_vm4 = vcmp.gt.f32.partialorder %v1700_v39, 0.0 }
 0x4e7   : > { %2892 = vpow2.f32 %v1723_v32  ;;  %v1725_v43 = vmul.f32 1.442695, %v1718_v29 }
 0x4e8   : > { %2894 = vpow2.f32 %v1719_v40  ;;  %v1721_v41 = vmul.f32 1.442695, %v1716_v42 }
 0x4e9   : > { %2896 = vpow2.f32 %v1725_v43 }
 0x4ea   : > { %2898 = vpow2.f32 %v1721_v41 }
 0x4f1   : > { %v2893_v44 = vpop.eup %2892 }
 0x4f2   : > { %v2895_v46 = vpop.eup %2894  ;;  %v2461_v47 = vadd.f32 -1.0, %v2893_v44 }
 0x4f3   : > { %v2897_v49 = vpop.eup %2896  ;;  %v2459_v50 = vadd.f32 -1.0, %v2895_v46 }
 0x4f4   : > { %v2899_v51 = vpop.eup %2898  ;;  %v2462_v52 = vadd.f32 -1.0, %v2897_v49  ;;  %v1733_v54 = vsel %vm1713_vm1, %v1705_v34, %v2461_v47 }
 0x4f5   : > { %v2460_v53 = vadd.f32 -1.0, %v2899_v51  ;;  %v1731_v59 = vsel %vm1711_vm3, %v1697_v21, %v2459_v50  ;;  %v2831_v21 = vld [vmem:[%s3653_s9 + $0x8] sm:$0xff]  }
 0x4f6   : > { %v1734_v55 = vsel %vm1714_vm2, %v1708_v37, %v2462_v52 }
 0x4f7   : > { %v1736_v62 = vpack.c.bf16 %v1734_v55, %v1733_v54  ;;  %v1732_v45 = vsel %vm1712_vm4, %v1700_v39, %v2460_v53 }
 0x4f8   : > { %v1735_v56 = vpack.c.bf16 %v1732_v45, %v1731_v59 }
 0x4fa   : > { %2588 = vmatprep.mubr.msk.bf16.mxu0 %vm1655_vm0, %v1735_v56 }
 0x4fb   : > { %2589 = vmatmul.mubr.msk.bf16.vlgmr.msra.gmra.mrb[16].mxu0 %vm1655_vm0, %v1736_v62 }
 0x4fc   : > { %2607 = vmatpush3.bf16.msra.mxu0 %v2830_v35 }
 0x4fd   : > { %2608 = vmatprep.subr.bf16.mxu0 %v2831_v21 }
 0x500   : > { %2609 = vmatpush3.bf16.msra.mxu0 %v2831_v21 }
 0x501   : > { %2610 = vmatprep.subr.bf16.mxu0 %v2832_v27 }
 0x504   : > { %2611 = vmatpush3.bf16.msra.mxu0 %v2832_v27 }
 0x5ce   : > { %v2590_v61 = vpop.f32.mrb[16].mxu0 }
 0x5cf   : > { %v1825_v0 = vadd.f32 %v2590_v61, %v2463_v60  ;;  %v1816_v1 = vpop.f32.mrb[17].mxu0 }
 0x5d0   : > { %v1817_v3 = vadd.f32 %v2463_v60, %v1816_v1  ;;  %v2591_v4 = vpop.f32.mrb[18].mxu0  ;;  %v2835_v1 = vld [vmem:[%s3654_s10 + $0x8] sm:$0xff]  }
 0x5d1   : > { %v1837_v5 = vmin.f32 %v1825_v0, 0.0  ;;  %v1828_v7 = vadd.f32 %v2591_v4, %v2463_v60  ;;  %v1819_v8 = vpop.f32.mrb[19].mxu0  ;;  %vm1833_vm5 = vcmp.gt.f32.partialorder %v1825_v0, 0.0 }
 0x5d2   : > { %v1835_v9 = vmin.f32 %v1817_v3, 0.0  ;;  %v1820_v10 = vadd.f32 %v2463_v60, %v1819_v8  ;;  %vm1831_vm7 = vcmp.gt.f32.partialorder %v1817_v3, 0.0 }
 0x5d3   : > { %v1843_v11 = vmul.f32 1.442695, %v1837_v5  ;;  %v1838_v14 = vmin.f32 %v1828_v7, 0.0  ;;  %vm1834_vm6 = vcmp.gt.f32.partialorder %v1828_v7, 0.0 }
 0x5d4   : > { %v1839_v16 = vmul.f32 1.442695, %v1835_v9  ;;  %v1836_v17 = vmin.f32 %v1820_v10, 0.0  ;;  %vm1832_vm8 = vcmp.gt.f32.partialorder %v1820_v10, 0.0 }
 0x5d5   : > { %2900 = vpow2.f32 %v1843_v11  ;;  %v1845_v18 = vmul.f32 1.442695, %v1838_v14 }
 0x5d6   : > { %2902 = vpow2.f32 %v1839_v16  ;;  %v1841_v2 = vmul.f32 1.442695, %v1836_v17 }
 0x5d7   : > { %2904 = vpow2.f32 %v1845_v18 }
 0x5d8   : > { %2906 = vpow2.f32 %v1841_v2 }
 0x5df   : > { %v2901_v19 = vpop.eup %2900 }
 0x5e0   : > { %v2903_v20 = vpop.eup %2902  ;;  %v2472_v22 = vadd.f32 -1.0, %v2901_v19 }
 0x5e1   : > { %v2905_v24 = vpop.eup %2904  ;;  %v2470_v25 = vadd.f32 -1.0, %v2903_v20 }
 0x5e2   : > { %v2907_v26 = vpop.eup %2906  ;;  %v2473_v28 = vadd.f32 -1.0, %v2905_v24  ;;  %v1853_v31 = vsel %vm1833_vm5, %v1825_v0, %v2472_v22  ;;  %v2834_v0 = vld [vmem:[%s3654_s10] sm:$0xff]  }
 0x5e3   : > { %v2471_v30 = vadd.f32 -1.0, %v2907_v26  ;;  %v1851_v13 = vsel %vm1831_vm7, %v1817_v3, %v2470_v25  ;;  %v2486_v3 = vld [vmem:[%s3655_s11 + $0xa] ss:$0 sm:$0xff] }
 0x5e4   : > { %v1854_v33 = vsel %vm1834_vm6, %v1828_v7, %v2473_v28 }
 0x5e5   : > { %v1856_v12 = vpack.c.bf16 %v1854_v33, %v1853_v31  ;;  %v1852_v15 = vsel %vm1832_vm8, %v1820_v10, %v2471_v30 }
 0x5e6   : > { %v1855_v34 = vpack.c.bf16 %v1852_v15, %v1851_v13 }
 0x5e8   : > { %2596 = vmatprep.mubr.msk.bf16.mxu1 %vm1875_vm9, %v1855_v34 }
 0x5e9   : > { %2597 = vmatmul.mubr.msk.bf16.vlgmr.msra.gmra.mrb[24].mxu1 %vm1875_vm9, %v1856_v12 }
 0x5ea   : > { %2601 = vmatpush3.bf16.msra.mxu1 %v2829_v57  ;;  %2602 = vmatprep.mubr.msk.bf16.mxu1 %vm1937_vm10, %v3478_v58  ;;  %v2833_v58 = vld [vmem:[%s3653_s9 + $0x18] sm:$0xff]  }
 0x5eb   : > { %2612 = vmatprep.subr.bf16.mxu0 %v2833_v58  ;;  %2618 = vmatprep.subr.bf16.mxu1 %v2834_v0 }
 0x5ec   : > { %2613 = vmatpush3.bf16.msra.mxu0 %v2833_v58 }
 0x5f5   : > { %2603 = vmatmul.mubr.msk.bf16.vlgmr.msra.gmra.mrb[24].mxu1 %vm1937_vm10, %v3482_v6  ;;  %v2481_v6 = vld [vmem:[%s3655_s11 + $0x9] ss:$0 sm:$0xff] }
 0x5f6   : > { %2619 = vmatpush3.bf16.msra.mxu1 %v2834_v0 }
 0x5f7   : > { %2620 = vmatprep.subr.bf16.mxu1 %v2835_v1 }
 0x5fa   : > { %2621 = vmatpush3.bf16.msra.mxu1 %v2835_v1 }
 0x6c8   : > { %v2604_v36 = vpop.f32.mrb[24].mxu1 }
 0x6c9   : > { %v2002_v37 = vadd.f32 %v2604_v36, %v2481_v6  ;;  %v1978_v38 = vpop.f32.mrb[25].mxu1 }
 0x6ca   : > { %v2000_v23 = vadd.f32 %v2481_v6, %v1978_v38  ;;  %v2605_v39 = vpop.f32.mrb[26].mxu1 }
 0x6cb   : > { %v2010_v32 = vmin.f32 %v2002_v37, 0.0  ;;  %v2003_v29 = vadd.f32 %v2605_v39, %v2481_v6  ;;  %v1981_v40 = vpop.f32.mrb[27].mxu1  ;;  %vm2006_vm11 = vcmp.gt.f32.partialorder %v2002_v37, 0.0 }
 0x6cc   : > { %v2008_v42 = vmin.f32 %v2000_v23, 0.0  ;;  %v2001_v43 = vadd.f32 %v2481_v6, %v1981_v40  ;;  %vm2004_vm13 = vcmp.gt.f32.partialorder %v2000_v23, 0.0  ;;  %v2497_v6 = vld [vmem:[%s3655_s11 + $0xb] ss:$0 sm:$0xff] }
 0x6cd   : > { %v2016_v41 = vmul.f32 1.442695, %v2010_v32  ;;  %v2011_v44 = vmin.f32 %v2003_v29, 0.0  ;;  %vm2007_vm12 = vcmp.gt.f32.partialorder %v2003_v29, 0.0 }
 0x6ce   : > { %v2012_v46 = vmul.f32 1.442695, %v2008_v42  ;;  %v2009_v47 = vmin.f32 %v2001_v43, 0.0  ;;  %vm2005_vm14 = vcmp.gt.f32.partialorder %v2001_v43, 0.0 }
 0x6cf   : > { %2908 = vpow2.f32 %v2016_v41  ;;  %v2018_v49 = vmul.f32 1.442695, %v2011_v44 }
 0x6d0   : > { %2910 = vpow2.f32 %v2012_v46  ;;  %v2014_v50 = vmul.f32 1.442695, %v2009_v47 }
 0x6d1   : > { %2912 = vpow2.f32 %v2018_v49 }
 0x6d2   : > { %2914 = vpow2.f32 %v2014_v50 }
 0x6d9   : > { %v2909_v51 = vpop.eup %2908 }
 0x6da   : > { %v2911_v52 = vpop.eup %2910  ;;  %v2484_v53 = vadd.f32 -1.0, %v2909_v51 }
 0x6db   : > { %v2913_v54 = vpop.eup %2912  ;;  %v2482_v55 = vadd.f32 -1.0, %v2911_v52 }
 0x6dc   : > { %v2915_v59 = vpop.eup %2914  ;;  %v2485_v62 = vadd.f32 -1.0, %v2913_v54  ;;  %v2026_v56 = vsel %vm2006_vm11, %v2002_v37, %v2484_v53 }
 0x6dd   : > { %v2483_v45 = vadd.f32 -1.0, %v2915_v59  ;;  %v2024_v48 = vsel %vm2004_vm13, %v2000_v23, %v2482_v55 }
 0x6de   : > { %v2027_v63 = vsel %vm2007_vm12, %v2003_v29, %v2485_v62 }
 0x6df   : > { %v2029_v57 = vpack.c.bf16 %v2027_v63, %v2026_v56  ;;  %v2025_v60 = vsel %vm2005_vm14, %v2001_v43, %v2483_v45 }
 0x6e0   : > { %v2028_v61 = vpack.c.bf16 %v2025_v60, %v2024_v48 }
 0x6e2   : > { %2614 = vmatprep.mubr.msk.bf16.mxu0 %vm1655_vm0, %v2028_v61 }
 0x6e3   : > { %2615 = vmatmul.mubr.msk.bf16.vlgmr.msra.gmra.mrb[20].mxu0 %vm1655_vm0, %v2029_v57 }
 0x7b6   : > { %v2616_v4 = vpop.f32.mrb[20].mxu0 }
 0x7b7   : > { %v2118_v5 = vadd.f32 %v2616_v4, %v2486_v3  ;;  %v2109_v7 = vpop.f32.mrb[21].mxu0 }
 0x7b8   : > { %v2110_v8 = vadd.f32 %v2486_v3, %v2109_v7  ;;  %v2617_v9 = vpop.f32.mrb[22].mxu0 }
 0x7b9   : > { %v2130_v10 = vmin.f32 %v2118_v5, 0.0  ;;  %v2121_v11 = vadd.f32 %v2617_v9, %v2486_v3  ;;  %v2112_v14 = vpop.f32.mrb[23].mxu0  ;;  %vm2126_vm15 = vcmp.gt.f32.partialorder %v2118_v5, 0.0 }
 0x7ba   : > { %v2128_v16 = vmin.f32 %v2110_v8, 0.0  ;;  %v2113_v17 = vadd.f32 %v2486_v3, %v2112_v14  ;;  %vm2124_vm1 = vcmp.gt.f32.partialorder %v2110_v8, 0.0 }
 0x7bb   : > { %v2136_v18 = vmul.f32 1.442695, %v2130_v10  ;;  %v2131_v2 = vmin.f32 %v2121_v11, 0.0  ;;  %vm2127_vm0 = vcmp.gt.f32.partialorder %v2121_v11, 0.0 }
 0x7bc   : > { %v2132_v19 = vmul.f32 1.442695, %v2128_v16  ;;  %v2129_v20 = vmin.f32 %v2113_v17, 0.0  ;;  %vm2125_vm2 = vcmp.gt.f32.partialorder %v2113_v17, 0.0 }
 0x7bd   : > { %2916 = vpow2.f32 %v2136_v18  ;;  %v2138_v22 = vmul.f32 1.442695, %v2131_v2 }
 0x7be   : > { %2918 = vpow2.f32 %v2132_v19  ;;  %v2134_v24 = vmul.f32 1.442695, %v2129_v20 }
 0x7bf   : > { %2920 = vpow2.f32 %v2138_v22 }
 0x7c0   : > { %2922 = vpow2.f32 %v2134_v24 }
 0x7c7   : > { %v2917_v25 = vpop.eup %2916 }
 0x7c8   : > { %v2919_v26 = vpop.eup %2918  ;;  %v2495_v28 = vadd.f32 -1.0, %v2917_v25 }
 0x7c9   : > { %v2921_v30 = vpop.eup %2920  ;;  %v2493_v31 = vadd.f32 -1.0, %v2919_v26 }
 0x7ca   : > { %v2923_v33 = vpop.eup %2922  ;;  %v2496_v13 = vadd.f32 -1.0, %v2921_v30  ;;  %v2146_v15 = vsel %vm2126_vm15, %v2118_v5, %v2495_v28 }
 0x7cb   : > { %v2494_v12 = vadd.f32 -1.0, %v2923_v33  ;;  %v2144_v35 = vsel %vm2124_vm1, %v2110_v8, %v2493_v31 }
 0x7cc   : > { %v2147_v34 = vsel %vm2127_vm0, %v2121_v11, %v2496_v13 }
 0x7cd   : > { %v2149_v21 = vpack.c.bf16 %v2147_v34, %v2146_v15  ;;  %v2145_v27 = vsel %vm2125_vm2, %v2113_v17, %v2494_v12 }
 0x7ce   : > { %v2148_v58 = vpack.c.bf16 %v2145_v27, %v2144_v35 }
 0x7d0   : > { %2622 = vmatprep.mubr.msk.bf16.mxu1 %vm1875_vm9, %v2148_v58 }
 0x7d1   : > { %2623 = vmatmul.mubr.msk.bf16.vlgmr.msra.gmra.mrb[28].mxu1 %vm1875_vm9, %v2149_v21 }
 0x8a4   : > { %v2624_v36 = vpop.f32.mrb[28].mxu1 }
 0x8a5   : > { %v2222_v37 = vadd.f32 %v2624_v36, %v2497_v6  ;;  %v2213_v38 = vpop.f32.mrb[29].mxu1 }
 0x8a6   : > { %v2214_v23 = vadd.f32 %v2497_v6, %v2213_v38  ;;  %v2625_v39 = vpop.f32.mrb[30].mxu1 }
 0x8a7   : > { %2230 = vst [vmem:[%s409_s29 + $0x10] sm:$0xff] %v2222_v37  ;;  %v2225_v32 = vadd.f32 %v2625_v39, %v2497_v6  ;;  %v2216_v29 = vpop.f32.mrb[31].mxu1 }
 0x8a8   : > { %2228 = vst [vmem:[%s409_s29] sm:$0xff] %v2214_v23  ;;  %v2217_v40 = vadd.f32 %v2497_v6, %v2216_v29 }
 0x8a9   : > { %2231 = vst [vmem:[%s409_s29 + $0x18] sm:$0xff] %v2225_v32 }
 0x8aa   : > { %2229 = vst [vmem:[%s409_s29 + $0x8] sm:$0xff] %v2217_v40 }
 0x8ab   : > { %2937 = shalt.err (!%p2934_p3)
}
 0x8ac   : > { %s2938_s19 = scalar_lea.hbm %s3601_s18, 512  ;;  %s2942_s30 = scalar_lea.hbm %s3656_s12, 1024 }
 0x8ad   : > { %p2939_p4 = scmp.ne.s32.totalorder %s3601_s18, %s2938_s19  ;;  %p2943_p9 = scmp.lt.u32.totalorder %s3601_s18, %s3656_s12 }
 0x8ae   : > { %p2944_p10 = scmp.lt.u32.totalorder %s2942_s30, %s2938_s19  ;;  %p2946_p12 = scmp.lt.u32.totalorder %s2938_s19, %s3601_s18 }
 0x8af   : > { %p2940_p7 = pnand %p2939_p4, %p3095_p5 }
 0x8b0   : > { %p2945_p11 = por %p2944_p10, %p2943_p9 }
 0x8b1   : > { %p2941_p8 = pneg %p2940_p7 }
 0x8b2   : > { %p2947_p13 = por %p2946_p12, %p2945_p11 }
 0x8b4   : > { %p2948_p0 = pnand %p2947_p13, %p2941_p8 }
 0x8b6   : > { %2951 = shalt.err (!%p2948_p0)
}
 0x8b7   : > { %s2990_s23 = smov 128   ;;  %s2991_s26 = smov 8  }
 0x8b8   : > { %2646 = dma.vmem_to_hbm [thread:$0]  (%p3095_p5), %s3596_s15, 512, %s3601_s18, %s3603_s25, %s2990_s23, %s2990_s23, %s2991_s26  }
 0x8b9 PF: > { %p2652_p1 = scmp.ge.s32.totalorder %s2986_s24, 2  ;;  %s2261_s16 = sand.u32 1, %s2974_s21  }
 0x8ba   : > { %s2262_s19 = scalar_lea.sflag [#allocation3], %s2261_s16 }
 0x8bb   : > { %p2649_p2 = pnand %p2652_p1, %p3099_p6 }
 0x8bd   : > { %2969 = dma.done.wait (!%p2649_p2), %s2262_s19, 512  }
 0x8be   : > { %2971 = vsyncadd (!%p2649_p2), %s2262_s19, 4294966784  ;;  %s3662_s29 = sld [smem:[#allocation5_spill]]  ;;  %s3663_s23 = sld [smem:[#allocation6_spill]] }
 0x8bf   : > { %p22_p3 = scmp.ge.s32.totalorder %s3082_s27, 4   ;;  %s3664_s21 = smov %s2978_s22 }
 0x8c0   : > { %s3666_s24 = smov %s3082_s27 }
 0x8c1   :  { %24 = sbr.rel (!%p22_p3) target bundleno = 3 (0x3), region = 103 }
 0x8c4   : > { %s3665_s22 = smov %s3662_s29 }
 0x8c8   :  { %2267 = vsyncpa [#allocation3], 1 }
 0x8c9   :  { %2269 = vsyncpa [#allocation3 + $0x1], 1 }

</bundles_post_ra>
